<compile_context>
chip_gen: v7x
topology: tpu7x:2x2x1
jax: 0.10.0
libtpu: 0.0.40
codegen_flags: <defaults>
</compile_context>

<pallas_src>
import functools

import jax
import jax.numpy as jnp
from jax.experimental import pallas as pl
from jax.experimental.pallas import tpu as pltpu


_VMEM_LIMIT = 48 * 1024 * 1024  # safe on v5e/v6e (128 MiB phys) and v7x (64 MiB phys)


def _round_up(x, m):
    return ((x + m - 1) // m) * m


def _pick_tile(m, max_tile):
    # Biggest tile that fits the cap; always a multiple of 128 (lane-dense).
    if m <= max_tile:
        return _round_up(m, 128)
    return max_tile


# ----------------------------------------------------------------------------
# Kernel 1: conv-as-matmul fused with eval-mode BatchNorm (folded affine,
# conv bias pre-folded into shift) and ReLU.
#   out(Cout, tileM) = relu( (W @ patches) * scale + shift )
# ----------------------------------------------------------------------------
def _conv_bn_relu_kernel(w_ref, scale_ref, shift_ref, p_ref, o_ref):
    acc = jnp.dot(w_ref[...], p_ref[...], preferred_element_type=jnp.float32)
    y = acc * scale_ref[...] + shift_ref[...]
    o_ref[...] = jnp.maximum(y, 0.0).astype(o_ref.dtype)


def _im2col_cnhw(x, kh, kw, stride, pad):
    """x: (C, N, H, W) -> patches (kh*kw*C, N*Ho*Wo), K index ordered (tap, c)."""
    c, n, h, w = x.shape
    xp = jnp.pad(x, ((0, 0), (0, 0), (pad, pad), (pad, pad)))
    ho = (h + 2 * pad - kh) // stride + 1
    wo = (w + 2 * pad - kw) // stride + 1
    cols = []
    for i in range(kh):
        for j in range(kw):
            cols.append(xp[:, :, i:i + stride * ho:stride, j:j + stride * wo:stride])
    patches = jnp.stack(cols, axis=0)                 # (kh*kw, C, N, Ho, Wo)
    patches = patches.reshape(kh * kw * c, n * ho * wo)
    return patches, (n, ho, wo)


def conv_bn_relu(x_cnhw, layer, *, ksize, stride, pad, max_tile_m=1024):
    cout, kdim = layer["w"].shape
    patches, (n, ho, wo) = _im2col_cnhw(x_cnhw, ksize, ksize, stride, pad)
    k, m = patches.shape
    assert k == kdim, (k, kdim)

    tile_m = _pick_tile(m, max_tile_m)
    m_pad = _round_up(m, tile_m)
    if m_pad != m:
        patches = jnp.pad(patches, ((0, 0), (0, m_pad - m)))
    patches = patches.astype(jnp.bfloat16)

    out = pl.pallas_call(
        _conv_bn_relu_kernel,
        out_shape=jax.ShapeDtypeStruct((cout, m_pad), jnp.bfloat16),
        grid=(m_pad // tile_m,),
        in_specs=[
            pl.BlockSpec((cout, k), lambda i: (0, 0)),     # weights (bf16)
            pl.BlockSpec((cout, 1), lambda i: (0, 0)),     # BN scale (f32)
            pl.BlockSpec((cout, 1), lambda i: (0, 0)),     # BN shift + bias (f32)
            pl.BlockSpec((k, tile_m), lambda i: (0, i)),   # patch tile (bf16)
        ],
        out_specs=pl.BlockSpec((cout, tile_m), lambda i: (0, i)),
        compiler_params=pltpu.CompilerParams(
            dimension_semantics=("parallel",),
            vmem_limit_bytes=_VMEM_LIMIT),
    )(layer["w"], layer["scale"], layer["shift"], patches)

    return out[:, :m].reshape(cout, n, ho, wo)


# ----------------------------------------------------------------------------
# Kernel 2: fused FC head.
#   h = relu((x @ W1) * s1 + t1)        (Linear + Frozen_BatchNorm1d + ReLU)
#   y = h @ W2 + b2                     (final Linear, classes padded to 128)
# The 128-wide intermediate h stays on-chip.
# ----------------------------------------------------------------------------
def _mlp_head_kernel(w1_ref, s1_ref, t1_ref, w2_ref, b2_ref, x_ref, o_ref):
    h = jnp.dot(x_ref[...], w1_ref[...], preferred_element_type=jnp.float32)
    h = jnp.maximum(h * s1_ref[...] + t1_ref[...], 0.0)
    y = jnp.dot(h.astype(w2_ref.dtype), w2_ref[...],
                preferred_element_type=jnp.float32)
    o_ref[...] = (y + b2_ref[...]).astype(o_ref.dtype)


def mlp_head(x_flat, head, *, num_classes, max_tile_b=256):
    b, k = x_flat.shape
    tile_b = min(max_tile_b, _round_up(b, 8))
    b_pad = _round_up(b, tile_b)
    if b_pad != b:
        x_flat = jnp.pad(x_flat, ((0, b_pad - b), (0, 0)))
    x_flat = x_flat.astype(jnp.bfloat16)
    n_pad = head["w2"].shape[1]                       # classes padded to 128

    out = pl.pallas_call(
        _mlp_head_kernel,
        out_shape=jax.ShapeDtypeStruct((b_pad, n_pad), jnp.float32),
        grid=(b_pad // tile_b,),
        in_specs=[
            pl.BlockSpec((k, 128), lambda i: (0, 0)),      # W1 (bf16)
            pl.BlockSpec((1, 128), lambda i: (0, 0)),      # BN scale (f32)
            pl.BlockSpec((1, 128), lambda i: (0, 0)),      # BN shift + bias (f32)
            pl.BlockSpec((128, n_pad), lambda i: (0, 0)),  # W2 padded (bf16)
            pl.BlockSpec((1, n_pad), lambda i: (0, 0)),    # b2 padded (f32)
            pl.BlockSpec((tile_b, k), lambda i: (i, 0)),   # x tile (bf16)
        ],
        out_specs=pl.BlockSpec((tile_b, n_pad), lambda i: (i, 0)),
        compiler_params=pltpu.CompilerParams(
            dimension_semantics=("parallel",),
            vmem_limit_bytes=_VMEM_LIMIT),
    )(head["w1"], head["s1"], head["t1"], head["w2"], head["b2"], x_flat)

    return out[:b, :num_classes]


# ----------------------------------------------------------------------------
# One-time parameter preparation (layout, BN folding, bias folding, bf16 cast).
# ----------------------------------------------------------------------------
def _bn_affine(bn):
    gamma, beta, mean, var, eps = bn
    scale = gamma / jnp.sqrt(var + eps)
    shift = beta - mean * scale
    return scale, shift


def prepare_params(p, num_classes=10):
    def conv_prep(w, b, bn):
        cout, cin, kh, kw = w.shape
        # K index ordered (kh, kw, cin) to match _im2col_cnhw.
        w2 = jnp.transpose(w, (0, 2, 3, 1)).reshape(cout, kh * kw * cin)
        scale, shift = _bn_affine(bn)
        shift = shift + b * scale                  # fold conv bias: (acc+b)*s+t
        return dict(w=w2.astype(jnp.bfloat16),
                    scale=scale.reshape(cout, 1).astype(jnp.float32),
                    shift=shift.reshape(cout, 1).astype(jnp.float32))

    scale4, shift4 = _bn_affine(p["bn4"])
    shift4 = shift4 + p["b4"] * scale4             # fold FC1 bias into BN shift

    n_pad = _round_up(num_classes, 128)
    w5 = jnp.transpose(p["w5"])                    # (128, num_classes)
    w5p = jnp.zeros((128, n_pad), jnp.float32).at[:, :num_classes].set(w5)
    b5p = jnp.zeros((1, n_pad), jnp.float32).at[0, :num_classes].set(p["b5"])

    return {
        "conv1": conv_prep(p["w1"], p["b1"], p["bn1"]),
        "conv2": conv_prep(p["w2"], p["b2"], p["bn2"]),
        "conv3": conv_prep(p["w3"], p["b3"], p["bn3"]),
        "head": dict(
            w1=jnp.transpose(p["w4"]).astype(jnp.bfloat16),    # (1568, 128)
            s1=scale4.reshape(1, 128).astype(jnp.float32),
            t1=shift4.reshape(1, 128).astype(jnp.float32),
            w2=w5p.astype(jnp.bfloat16),
            b2=b5p,
        ),
    }


# ----------------------------------------------------------------------------
# Full forward pass of MNIST_Network_ADJ (eval mode == full nn.Sequential).
# ----------------------------------------------------------------------------
def mnist_network_adj_forward(x_nchw, prep, *, num_classes):
    # NCHW -> CNHW (channels-major): conv outputs become lane-dense over N*H*W.
    x = jnp.transpose(x_nchw, (1, 0, 2, 3)).astype(jnp.bfloat16)
    x = conv_bn_relu(x, prep["conv1"], ksize=3, stride=1, pad=1)   # (16, N, 28, 28)
    x = conv_bn_relu(x, prep["conv2"], ksize=4, stride=2, pad=1)   # (32, N, 14, 14)
    x = conv_bn_relu(x, prep["conv3"], ksize=4, stride=2, pad=1)   # (32, N, 7, 7)
    c, n, h, w = x.shape
    # torch nn.Flatten on NCHW ordering: (N, C*H*W) = (N, 1568)
    x = jnp.transpose(x, (1, 0, 2, 3)).reshape(n, c * h * w)
    return mlp_head(x, prep["head"], num_classes=num_classes)


# ----------------------------------------------------------------------------
# Deterministic synthetic parameters (shapes from MNIST_Network_ADJ.__init__).
# ----------------------------------------------------------------------------
def init_params(key, num_classes=10):
    ks = jax.random.split(key, 16)

    def bn_params(k, n):
        k1, k2, k3, k4 = jax.random.split(k, 4)
        gamma = 1.0 + 0.1 * jax.random.normal(k1, (n,), jnp.float32)
        beta = 0.1 * jax.random.normal(k2, (n,), jnp.float32)
        mean = 0.1 * jax.random.normal(k3, (n,), jnp.float32)
        var = jnp.abs(jax.random.normal(k4, (n,), jnp.float32)) + 0.5
        return (gamma, beta, mean, var, jnp.float32(1e-5))

    p = {
        "w1": 0.1 * jax.random.normal(ks[0], (16, 1, 3, 3), jnp.float32),
        "b1": 0.1 * jax.random.normal(ks[1], (16,), jnp.float32),
        "bn1": bn_params(ks[2], 16),
        "w2": 0.1 * jax.random.normal(ks[3], (32, 16, 4, 4), jnp.float32),
        "b2": 0.1 * jax.random.normal(ks[4], (32,), jnp.float32),
        "bn2": bn_params(ks[5], 32),
        "w3": 0.1 * jax.random.normal(ks[6], (32, 32, 4, 4), jnp.float32),
        "b3": 0.1 * jax.random.normal(ks[7], (32,), jnp.float32),
        "bn3": bn_params(ks[8], 32),
        "w4": 0.05 * jax.random.normal(ks[9], (128, 7 * 7 * 32), jnp.float32),
        "b4": 0.1 * jax.random.normal(ks[10], (128,), jnp.float32),
        "bn4": bn_params(ks[11], 128),
        "w5": 0.1 * jax.random.normal(ks[12], (num_classes, 128), jnp.float32),
        "b5": 0.1 * jax.random.normal(ks[13], (num_classes,), jnp.float32),
    }
    return p


if __name__ == "__main__":
    key = jax.random.PRNGKey(0)
    k_x, k_p = jax.random.split(key)
    # MNIST-shaped input (28x28 is required by the 7*7*32 flatten); small batch.
    x = jax.random.normal(k_x, (2, 1, 28, 28), jnp.float32)
    params = init_params(k_p, num_classes=10)

    # One-time host-side layout / BN-fold / bf16 prep (hoisted out of forward).
    prep = prepare_params(params, num_classes=10)

    fwd = jax.jit(functools.partial(mnist_network_adj_forward, num_classes=10))
    out = jax.block_until_ready(fwd(x, prep))
    assert out.shape == (2, 10) and out.dtype == jnp.float32
    print("KERNEL_OK")
</pallas_src>

<mosaic_0001>
module attributes {stable_mosaic.version = 11 : i64} {
  func.func @_conv_bn_relu_kernel(%arg0: i32, %arg1: memref<16x9xbf16, #tpu.memory_space<vmem>>, %arg2: memref<16x1xf32, #tpu.memory_space<vmem>>, %arg3: memref<16x1xf32, #tpu.memory_space<vmem>>, %arg4: memref<9x1024xbf16, #tpu.memory_space<vmem>>, %arg5: memref<16x1024xbf16, #tpu.memory_space<vmem>>) attributes {dimension_semantics = [#tpu.dimension_semantics<parallel>], iteration_bounds = array<i64: 2>, scalar_prefetch = 0 : i64, scratch_operands = 0 : i64, tpu.core_type = #tpu.core_type<tc>, window_params = [{pipeline_mode = #tpu.pipeline_mode<synchronous>, transform_indices = @transform_0, window_bounds = array<i64: 16, 9>}, {pipeline_mode = #tpu.pipeline_mode<synchronous>, transform_indices = @transform_1, window_bounds = array<i64: 16, 1>}, {pipeline_mode = #tpu.pipeline_mode<synchronous>, transform_indices = @transform_2, window_bounds = array<i64: 16, 1>}, {transform_indices = @transform_3, window_bounds = array<i64: 9, 1024>}, {transform_indices = @transform_4, window_bounds = array<i64: 16, 1024>}]} {
    %c0 = arith.constant 0 : index
    %c0_0 = arith.constant 0 : index
    %0 = vector.load %arg1[%c0, %c0_0] : memref<16x9xbf16, #tpu.memory_space<vmem>>, vector<16x9xbf16>
    %c0_1 = arith.constant 0 : index
    %c0_2 = arith.constant 0 : index
    %1 = vector.load %arg4[%c0_1, %c0_2] : memref<9x1024xbf16, #tpu.memory_space<vmem>>, vector<9x1024xbf16>
    %cst = arith.constant dense<0.000000e+00> : vector<16x1024xf32>
    %2 = tpu.matmul %0, %1, %cst {dimension_numbers = #tpu.dot_dimension_numbers<[1], [0], [0], [1], [0, 0, 1, 1], [], []>} : vector<16x9xbf16>, vector<9x1024xbf16>, vector<16x1024xf32> -> vector<16x1024xf32>
    %c0_3 = arith.constant 0 : index
    %c0_4 = arith.constant 0 : index
    %3 = vector.load %arg2[%c0_3, %c0_4] : memref<16x1xf32, #tpu.memory_space<vmem>>, vector<16x1xf32>
    %4 = vector.broadcast %3 : vector<16x1xf32> to vector<16x1024xf32>
    %5 = arith.mulf %2, %4 : vector<16x1024xf32>
    %c0_5 = arith.constant 0 : index
    %c0_6 = arith.constant 0 : index
    %6 = vector.load %arg3[%c0_5, %c0_6] : memref<16x1xf32, #tpu.memory_space<vmem>>, vector<16x1xf32>
    %7 = vector.broadcast %6 : vector<16x1xf32> to vector<16x1024xf32>
    %8 = arith.addf %5, %7 : vector<16x1024xf32>
    %cst_7 = arith.constant 0.000000e+00 : f32
    %9 = vector.broadcast %cst_7 : f32 to vector<16x1024xf32>
    %10 = arith.maximumf %8, %9 : vector<16x1024xf32>
    %11 = arith.truncf %10 : vector<16x1024xf32> to vector<16x1024xbf16>
    %c0_8 = arith.constant 0 : index
    %c0_9 = arith.constant 0 : index
    %12 = vector.load %arg5[%c0_8, %c0_9] : memref<16x1024xbf16, #tpu.memory_space<vmem>>, vector<16x1024xbf16>
    tpu.vector_store %arg5[%c0_8, %c0_9], %11 {strides = array<i32>} : memref<16x1024xbf16, #tpu.memory_space<vmem>>, vector<16x1024xbf16>,
    return
  }
  func.func @transform_0(%arg0: i32) -> (i32, i32) {
    %c0_i32 = arith.constant 0 : i32
    %c0_i32_0 = arith.constant 0 : i32
    %c0_i32_1 = arith.constant 0 : i32
    return %c0_i32, %c0_i32_0 : i32, i32
  }
  func.func @transform_1(%arg0: i32) -> (i32, i32) {
    %c0_i32 = arith.constant 0 : i32
    %c0_i32_0 = arith.constant 0 : i32
    %c0_i32_1 = arith.constant 0 : i32
    return %c0_i32, %c0_i32_0 : i32, i32
  }
  func.func @transform_2(%arg0: i32) -> (i32, i32) {
    %c0_i32 = arith.constant 0 : i32
    %c0_i32_0 = arith.constant 0 : i32
    %c0_i32_1 = arith.constant 0 : i32
    return %c0_i32, %c0_i32_0 : i32, i32
  }
  func.func @transform_3(%arg0: i32) -> (i32, i32) {
    %c0_i32 = arith.constant 0 : i32
    %c0_i32_0 = arith.constant 0 : i32
    return %c0_i32, %arg0 : i32, i32
  }
  func.func @transform_4(%arg0: i32) -> (i32, i32) {
    %c0_i32 = arith.constant 0 : i32
    %c0_i32_0 = arith.constant 0 : i32
    return %c0_i32, %arg0 : i32, i32
  }
}

module attributes {stable_mosaic.version = 11 : i64} {
  func.func @_conv_bn_relu_kernel(%arg0: i32, %arg1: memref<32x256xbf16, #tpu.memory_space<vmem>>, %arg2: memref<32x1xf32, #tpu.memory_space<vmem>>, %arg3: memref<32x1xf32, #tpu.memory_space<vmem>>, %arg4: memref<256x512xbf16, #tpu.memory_space<vmem>>, %arg5: memref<32x512xbf16, #tpu.memory_space<vmem>>) attributes {dimension_semantics = [#tpu.dimension_semantics<parallel>], iteration_bounds = array<i64: 1>, scalar_prefetch = 0 : i64, scratch_operands = 0 : i64, tpu.core_type = #tpu.core_type<tc>, window_params = [{pipeline_mode = #tpu.pipeline_mode<synchronous>, transform_indices = @transform_0, window_bounds = array<i64: 32, 256>}, {pipeline_mode = #tpu.pipeline_mode<synchronous>, transform_indices = @transform_1, window_bounds = array<i64: 32, 1>}, {pipeline_mode = #tpu.pipeline_mode<synchronous>, transform_indices = @transform_2, window_bounds = array<i64: 32, 1>}, {transform_indices = @transform_3, window_bounds = array<i64: 256, 512>}, {transform_indices = @transform_4, window_bounds = array<i64: 32, 512>}]} {
    %c0 = arith.constant 0 : index
    %c0_0 = arith.constant 0 : index
    %0 = vector.load %arg1[%c0, %c0_0] : memref<32x256xbf16, #tpu.memory_space<vmem>>, vector<32x256xbf16>
    %c0_1 = arith.constant 0 : index
    %c0_2 = arith.constant 0 : index
    %1 = vector.load %arg4[%c0_1, %c0_2] : memref<256x512xbf16, #tpu.memory_space<vmem>>, vector<256x512xbf16>
    %cst = arith.constant dense<0.000000e+00> : vector<32x512xf32>
    %2 = tpu.matmul %0, %1, %cst {dimension_numbers = #tpu.dot_dimension_numbers<[1], [0], [0], [1], [0, 0, 1, 1], [], []>} : vector<32x256xbf16>, vector<256x512xbf16>, vector<32x512xf32> -> vector<32x512xf32>
    %c0_3 = arith.constant 0 : index
    %c0_4 = arith.constant 0 : index
    %3 = vector.load %arg2[%c0_3, %c0_4] : memref<32x1xf32, #tpu.memory_space<vmem>>, vector<32x1xf32>
    %4 = vector.broadcast %3 : vector<32x1xf32> to vector<32x512xf32>
    %5 = arith.mulf %2, %4 : vector<32x512xf32>
    %c0_5 = arith.constant 0 : index
    %c0_6 = arith.constant 0 : index
    %6 = vector.load %arg3[%c0_5, %c0_6] : memref<32x1xf32, #tpu.memory_space<vmem>>, vector<32x1xf32>
    %7 = vector.broadcast %6 : vector<32x1xf32> to vector<32x512xf32>
    %8 = arith.addf %5, %7 : vector<32x512xf32>
    %cst_7 = arith.constant 0.000000e+00 : f32
    %9 = vector.broadcast %cst_7 : f32 to vector<32x512xf32>
    %10 = arith.maximumf %8, %9 : vector<32x512xf32>
    %11 = arith.truncf %10 : vector<32x512xf32> to vector<32x512xbf16>
    %c0_8 = arith.constant 0 : index
    %c0_9 = arith.constant 0 : index
    %12 = vector.load %arg5[%c0_8, %c0_9] : memref<32x512xbf16, #tpu.memory_space<vmem>>, vector<32x512xbf16>
    tpu.vector_store %arg5[%c0_8, %c0_9], %11 {strides = array<i32>} : memref<32x512xbf16, #tpu.memory_space<vmem>>, vector<32x512xbf16>,
    return
  }
  func.func @transform_0(%arg0: i32) -> (i32, i32) {
    %c0_i32 = arith.constant 0 : i32
    %c0_i32_0 = arith.constant 0 : i32
    %c0_i32_1 = arith.constant 0 : i32
    return %c0_i32, %c0_i32_0 : i32, i32
  }
  func.func @transform_1(%arg0: i32) -> (i32, i32) {
    %c0_i32 = arith.constant 0 : i32
    %c0_i32_0 = arith.constant 0 : i32
    %c0_i32_1 = arith.constant 0 : i32
    return %c0_i32, %c0_i32_0 : i32, i32
  }
  func.func @transform_2(%arg0: i32) -> (i32, i32) {
    %c0_i32 = arith.constant 0 : i32
    %c0_i32_0 = arith.constant 0 : i32
    %c0_i32_1 = arith.constant 0 : i32
    return %c0_i32, %c0_i32_0 : i32, i32
  }
  func.func @transform_3(%arg0: i32) -> (i32, i32) {
    %c0_i32 = arith.constant 0 : i32
    %c0_i32_0 = arith.constant 0 : i32
    return %c0_i32, %arg0 : i32, i32
  }
  func.func @transform_4(%arg0: i32) -> (i32, i32) {
    %c0_i32 = arith.constant 0 : i32
    %c0_i32_0 = arith.constant 0 : i32
    return %c0_i32, %arg0 : i32, i32
  }
}

module attributes {stable_mosaic.version = 11 : i64} {
  func.func @_conv_bn_relu_kernel(%arg0: i32, %arg1: memref<32x512xbf16, #tpu.memory_space<vmem>>, %arg2: memref<32x1xf32, #tpu.memory_space<vmem>>, %arg3: memref<32x1xf32, #tpu.memory_space<vmem>>, %arg4: memref<512x128xbf16, #tpu.memory_space<vmem>>, %arg5: memref<32x128xbf16, #tpu.memory_space<vmem>>) attributes {dimension_semantics = [#tpu.dimension_semantics<parallel>], iteration_bounds = array<i64: 1>, scalar_prefetch = 0 : i64, scratch_operands = 0 : i64, tpu.core_type = #tpu.core_type<tc>, window_params = [{pipeline_mode = #tpu.pipeline_mode<synchronous>, transform_indices = @transform_0, window_bounds = array<i64: 32, 512>}, {pipeline_mode = #tpu.pipeline_mode<synchronous>, transform_indices = @transform_1, window_bounds = array<i64: 32, 1>}, {pipeline_mode = #tpu.pipeline_mode<synchronous>, transform_indices = @transform_2, window_bounds = array<i64: 32, 1>}, {transform_indices = @transform_3, window_bounds = array<i64: 512, 128>}, {transform_indices = @transform_4, window_bounds = array<i64: 32, 128>}]} {
    %c0 = arith.constant 0 : index
    %c0_0 = arith.constant 0 : index
    %0 = vector.load %arg1[%c0, %c0_0] : memref<32x512xbf16, #tpu.memory_space<vmem>>, vector<32x512xbf16>
    %c0_1 = arith.constant 0 : index
    %c0_2 = arith.constant 0 : index
    %1 = vector.load %arg4[%c0_1, %c0_2] : memref<512x128xbf16, #tpu.memory_space<vmem>>, vector<512x128xbf16>
    %cst = arith.constant dense<0.000000e+00> : vector<32x128xf32>
    %2 = tpu.matmul %0, %1, %cst {dimension_numbers = #tpu.dot_dimension_numbers<[1], [0], [0], [1], [0, 0, 1, 1], [], []>} : vector<32x512xbf16>, vector<512x128xbf16>, vector<32x128xf32> -> vector<32x128xf32>
    %c0_3 = arith.constant 0 : index
    %c0_4 = arith.constant 0 : index
    %3 = vector.load %arg2[%c0_3, %c0_4] : memref<32x1xf32, #tpu.memory_space<vmem>>, vector<32x1xf32>
    %4 = vector.broadcast %3 : vector<32x1xf32> to vector<32x128xf32>
    %5 = arith.mulf %2, %4 : vector<32x128xf32>
    %c0_5 = arith.constant 0 : index
    %c0_6 = arith.constant 0 : index
    %6 = vector.load %arg3[%c0_5, %c0_6] : memref<32x1xf32, #tpu.memory_space<vmem>>, vector<32x1xf32>
    %7 = vector.broadcast %6 : vector<32x1xf32> to vector<32x128xf32>
    %8 = arith.addf %5, %7 : vector<32x128xf32>
    %cst_7 = arith.constant 0.000000e+00 : f32
    %9 = vector.broadcast %cst_7 : f32 to vector<32x128xf32>
    %10 = arith.maximumf %8, %9 : vector<32x128xf32>
    %11 = arith.truncf %10 : vector<32x128xf32> to vector<32x128xbf16>
    %c0_8 = arith.constant 0 : index
    %c0_9 = arith.constant 0 : index
    %12 = vector.load %arg5[%c0_8, %c0_9] : memref<32x128xbf16, #tpu.memory_space<vmem>>, vector<32x128xbf16>
    tpu.vector_store %arg5[%c0_8, %c0_9], %11 {strides = array<i32>} : memref<32x128xbf16, #tpu.memory_space<vmem>>, vector<32x128xbf16>,
    return
  }
  func.func @transform_0(%arg0: i32) -> (i32, i32) {
    %c0_i32 = arith.constant 0 : i32
    %c0_i32_0 = arith.constant 0 : i32
    %c0_i32_1 = arith.constant 0 : i32
    return %c0_i32, %c0_i32_0 : i32, i32
  }
  func.func @transform_1(%arg0: i32) -> (i32, i32) {
    %c0_i32 = arith.constant 0 : i32
    %c0_i32_0 = arith.constant 0 : i32
    %c0_i32_1 = arith.constant 0 : i32
    return %c0_i32, %c0_i32_0 : i32, i32
  }
  func.func @transform_2(%arg0: i32) -> (i32, i32) {
    %c0_i32 = arith.constant 0 : i32
    %c0_i32_0 = arith.constant 0 : i32
    %c0_i32_1 = arith.constant 0 : i32
    return %c0_i32, %c0_i32_0 : i32, i32
  }
  func.func @transform_3(%arg0: i32) -> (i32, i32) {
    %c0_i32 = arith.constant 0 : i32
    %c0_i32_0 = arith.constant 0 : i32
    return %c0_i32, %arg0 : i32, i32
  }
  func.func @transform_4(%arg0: i32) -> (i32, i32) {
    %c0_i32 = arith.constant 0 : i32
    %c0_i32_0 = arith.constant 0 : i32
    return %c0_i32, %arg0 : i32, i32
  }
}

module attributes {stable_mosaic.version = 11 : i64} {
  func.func @_mlp_head_kernel(%arg0: i32, %arg1: memref<1568x128xbf16, #tpu.memory_space<vmem>>, %arg2: memref<1x128xf32, #tpu.memory_space<vmem>>, %arg3: memref<1x128xf32, #tpu.memory_space<vmem>>, %arg4: memref<128x128xbf16, #tpu.memory_space<vmem>>, %arg5: memref<1x128xf32, #tpu.memory_space<vmem>>, %arg6: memref<8x1568xbf16, #tpu.memory_space<vmem>>, %arg7: memref<8x128xf32, #tpu.memory_space<vmem>>) attributes {dimension_semantics = [#tpu.dimension_semantics<parallel>], iteration_bounds = array<i64: 1>, scalar_prefetch = 0 : i64, scratch_operands = 0 : i64, tpu.core_type = #tpu.core_type<tc>, window_params = [{pipeline_mode = #tpu.pipeline_mode<synchronous>, transform_indices = @transform_0, window_bounds = array<i64: 1568, 128>}, {pipeline_mode = #tpu.pipeline_mode<synchronous>, transform_indices = @transform_1, window_bounds = array<i64: 1, 128>}, {pipeline_mode = #tpu.pipeline_mode<synchronous>, transform_indices = @transform_2, window_bounds = array<i64: 1, 128>}, {pipeline_mode = #tpu.pipeline_mode<synchronous>, transform_indices = @transform_3, window_bounds = array<i64: 128, 128>}, {pipeline_mode = #tpu.pipeline_mode<synchronous>, transform_indices = @transform_4, window_bounds = array<i64: 1, 128>}, {transform_indices = @transform_5, window_bounds = array<i64: 8, 1568>}, {transform_indices = @transform_6, window_bounds = array<i64: 8, 128>}]} {
    %c0 = arith.constant 0 : index
    %c0_0 = arith.constant 0 : index
    %0 = vector.load %arg6[%c0, %c0_0] : memref<8x1568xbf16, #tpu.memory_space<vmem>>, vector<8x1568xbf16>
    %c0_1 = arith.constant 0 : index
    %c0_2 = arith.constant 0 : index
    %1 = vector.load %arg1[%c0_1, %c0_2] : memref<1568x128xbf16, #tpu.memory_space<vmem>>, vector<1568x128xbf16>
    %cst = arith.constant dense<0.000000e+00> : vector<8x128xf32>
    %2 = tpu.matmul %0, %1, %cst {dimension_numbers = #tpu.dot_dimension_numbers<[1], [0], [0], [1], [0, 0, 1, 1], [], []>} : vector<8x1568xbf16>, vector<1568x128xbf16>, vector<8x128xf32> -> vector<8x128xf32>
    %c0_3 = arith.constant 0 : index
    %c0_4 = arith.constant 0 : index
    %3 = vector.load %arg2[%c0_3, %c0_4] : memref<1x128xf32, #tpu.memory_space<vmem>>, vector<1x128xf32>
    %4 = vector.broadcast %3 : vector<1x128xf32> to vector<8x128xf32>
    %5 = arith.mulf %2, %4 : vector<8x128xf32>
    %c0_5 = arith.constant 0 : index
    %c0_6 = arith.constant 0 : index
    %6 = vector.load %arg3[%c0_5, %c0_6] : memref<1x128xf32, #tpu.memory_space<vmem>>, vector<1x128xf32>
    %7 = vector.broadcast %6 : vector<1x128xf32> to vector<8x128xf32>
    %8 = arith.addf %5, %7 : vector<8x128xf32>
    %cst_7 = arith.constant 0.000000e+00 : f32
    %9 = vector.broadcast %cst_7 : f32 to vector<8x128xf32>
    %10 = arith.maximumf %8, %9 : vector<8x128xf32>
    %11 = arith.truncf %10 : vector<8x128xf32> to vector<8x128xbf16>
    %c0_8 = arith.constant 0 : index
    %c0_9 = arith.constant 0 : index
    %12 = vector.load %arg4[%c0_8, %c0_9] : memref<128x128xbf16, #tpu.memory_space<vmem>>, vector<128x128xbf16>
    %cst_10 = arith.constant dense<0.000000e+00> : vector<8x128xf32>
    %13 = tpu.matmul %11, %12, %cst_10 {dimension_numbers = #tpu.dot_dimension_numbers<[1], [0], [0], [1], [0, 0, 1, 1], [], []>} : vector<8x128xbf16>, vector<128x128xbf16>, vector<8x128xf32> -> vector<8x128xf32>
    %c0_11 = arith.constant 0 : index
    %c0_12 = arith.constant 0 : index
    %14 = vector.load %arg5[%c0_11, %c0_12] : memref<1x128xf32, #tpu.memory_space<vmem>>, vector<1x128xf32>
    %15 = vector.broadcast %14 : vector<1x128xf32> to vector<8x128xf32>
    %16 = arith.addf %13, %15 : vector<8x128xf32>
    %c0_13 = arith.constant 0 : index
    %c0_14 = arith.constant 0 : index
    %17 = vector.load %arg7[%c0_13, %c0_14] : memref<8x128xf32, #tpu.memory_space<vmem>>, vector<8x128xf32>
    tpu.vector_store %arg7[%c0_13, %c0_14], %16 {strides = array<i32>} : memref<8x128xf32, #tpu.memory_space<vmem>>, vector<8x128xf32>,
    return
  }
  func.func @transform_0(%arg0: i32) -> (i32, i32) {
    %c0_i32 = arith.constant 0 : i32
    %c0_i32_0 = arith.constant 0 : i32
    %c0_i32_1 = arith.constant 0 : i32
    return %c0_i32, %c0_i32_0 : i32, i32
  }
  func.func @transform_1(%arg0: i32) -> (i32, i32) {
    %c0_i32 = arith.constant 0 : i32
    %c0_i32_0 = arith.constant 0 : i32
    %c0_i32_1 = arith.constant 0 : i32
    return %c0_i32, %c0_i32_0 : i32, i32
  }
  func.func @transform_2(%arg0: i32) -> (i32, i32) {
    %c0_i32 = arith.constant 0 : i32
    %c0_i32_0 = arith.constant 0 : i32
    %c0_i32_1 = arith.constant 0 : i32
    return %c0_i32, %c0_i32_0 : i32, i32
  }
  func.func @transform_3(%arg0: i32) -> (i32, i32) {
    %c0_i32 = arith.constant 0 : i32
    %c0_i32_0 = arith.constant 0 : i32
    %c0_i32_1 = arith.constant 0 : i32
    return %c0_i32, %c0_i32_0 : i32, i32
  }
  func.func @transform_4(%arg0: i32) -> (i32, i32) {
    %c0_i32 = arith.constant 0 : i32
    %c0_i32_0 = arith.constant 0 : i32
    %c0_i32_1 = arith.constant 0 : i32
    return %c0_i32, %c0_i32_0 : i32, i32
  }
  func.func @transform_5(%arg0: i32) -> (i32, i32) {
    %c0_i32 = arith.constant 0 : i32
    %c0_i32_0 = arith.constant 0 : i32
    return %arg0, %c0_i32 : i32, i32
  }
  func.func @transform_6(%arg0: i32) -> (i32, i32) {
    %c0_i32 = arith.constant 0 : i32
    %c0_i32_0 = arith.constant 0 : i32
    return %arg0, %c0_i32 : i32, i32
  }
}

</mosaic_0001>

<bundles_post_ra>
// kernel: mnist_network_adj_forward.4
= control target key start
LH: loop header
LB: loop body
LE: loop exit
PB: predicated region body
PF: predicated region fallthrough
CT: control target
= control target key end

     0   :  { %9 = vsyncpa [#allocation3], 0  ;;  %s908_s15 = smov 0   ;;  %s910_s16 = smov 0   ;;  %s1077_s0 = inlined_call_operand.hbm [shape: bf16[16,9], index: 0, kind: input, shape index: {}]   ;;  %s1078_s1 = inlined_call_operand.vmem [shape: f32[16,1], index: 1, kind: input, shape index: {}]   ;;  %s1079_s2 = inlined_call_operand.vmem [shape: f32[16,1], index: 2, kind: input, shape index: {}]   ;;  %s1080_s3 = inlined_call_operand.vmem [shape: bf16[9,2048], index: 3, kind: input, shape index: {}]   ;;  %s1081_s4 = inlined_call_operand.vmem [shape: bf16[16,2048], index: 4, kind: output, shape index: {}]  }
   0x1   :  { %s912_s17 = smov 0  }
   0x2 LB: > { %s924_s18 = sadd.s32 4294967295, %s876_s17   ;;  %s927_s19 = sadd.s32 1, %s876_s17   ;;  %s876_s17 = sphi %s912_s17, %s1095_s17   ;;  %s872_s16 = sphi %s910_s16, %s1094_s16   ;;  %s868_s15 = sphi %s908_s15, %s1093_s15  }
   0x3   : > { %s82_s20 = ssub.s32 %s876_s17, %s927_s19  ;;  %s85_s21 = sadd.s32 1, %s872_s16 }
   0x4   : > { %p83_p0 = scmp.eq.s32.totalorder %s82_s20, 0  ;;  %p92_p1 = scmp.ne.s32.totalorder %s872_s16, %s868_s15 }
   0x5   : > { %p93_p2 = scmp.eq.s32.totalorder %s876_s17, 0  ;;  %p122_p3 = scmp.eq.s32.totalorder %s924_s18, 1 }
   0x6   : > { %s937_s22 = scalar_select %p83_p0, %s872_s16, %s85_s21  }
   0x7   : > { %p939_p4 = por %p93_p2, %p92_p1  ;;  %p943_p5 = por %p122_p3, %p92_p1 }
   0x8   : > { %p734_p6 = scmp.ge.s32.totalorder %s876_s17, 1  ;;  %p135_p7 = scmp.lt.s32.totalorder %s876_s17, 3 }
   0x9   : > { %s1084_s23 = scalar_select %p939_p4, 1, 0 }
   0xa   : > { %s1085_s24 = scalar_select %p943_p5, 1, 0 }
   0xb   : > { %p1082_p8 = scmp.eq.s32.totalorder %s924_s18, 0  ;;  %p950_p9 = pnand %p734_p6, %p135_p7 }
   0xc   : > { %s878_s26 = smov [#allocation2]   ;;  %s822_s5 = scalar_lea.hbm %s1077_s0, 128 }
   0xd   : > { %s1086_s25 = scalar_select %p950_p9, 1, 0 }
   0xe   : > { %s147_s27 = sshll.u32 %s878_s26, 4  ;;  %p784_p10 = pneg %p950_p9  ;;  %s148_s27 = int_to_ptr.vmem [resolvable:$true] %s147_s27 }
   0xf   : > { %p823_p12 = scmp.ne.s32.totalorder %s1077_s0, %s822_s5  ;;  %p829_p2 = scmp.lt.u32.totalorder %s822_s5, %s1077_s0 }
  0x10   : > { %p958_p11 = pnand %p1082_p8, %p784_p10 }
  0x12   : > { %p824_p13 = pneg %p958_p11 }
  0x14   : > { %p825_p0 = pnand %p824_p13, %p823_p12 }
  0x16   : > { %p826_p1 = pneg %p825_p0 }
  0x18   : > { %p831_p3 = pnand %p829_p2, %p826_p1 }
  0x1a   : > { %834 = shalt.err (!%p831_p3)
}
  0x1b   : > { %s835_s10 = scalar_lea.vmem %s148_s27, 128  ;;  %p843_p8 = scmp.lt.s32.totalorder %s148_s27, %s148_s27 }
  0x1c   : > { %p836_p6 = scmp.ne.s32.totalorder %s148_s27, %s835_s10  ;;  %p844_p5 = scmp.lt.s32.totalorder %s835_s10, %s835_s10 }
  0x1e   : > { %p838_p7 = pnand %p836_p6, %p824_p13  ;;  %p845_p9 = por %p844_p5, %p843_p8 }
  0x20   : > { %p839_p10 = pneg %p838_p7 }
  0x22   : > { %p846_p4 = pnand %p845_p9, %p839_p10 }
  0x24   : > { %849 = shalt.err (!%p846_p4)
}
  0x25   : > { %s879_s11 = smov 64   ;;  %s880_s12 = smov 4  }
  0x26   : > { %787 = dma.hbm_to_vmem [thread:$0]  (!%p958_p11), %s1077_s0, 128, %s148_s27, [#allocation3], %s879_s11, %s879_s11, %s880_s12  }
  0x27   : > { %p736_p12 = scmp.ge.s32.totalorder %s876_s17, 2 }
  0x28   : > { %p1088_p0 = scmp.ne.s32.totalorder (!%p736_p12), %s1084_s23, 0 }
  0x29   : > { %163 = sbr.rel (%p736_p12) target bundleno = 56 (0x38), region = 28 }
  0x30   : > { %166 = sbr.rel (!%p1088_p0) target bundleno = 56 (0x38), region = 32  ;;  %s168_s20 = sand.u32 (%p1088_p0), 1, %s872_s16  }
  0x31   : > { %s770_s21 = sshll.u32 (%p1088_p0), %s876_s17, 5  ;;  %s737_s26 = sshll.u32 (%p1088_p0), %s168_s20, 6 }
  0x32   : > { %s173_s5 = scalar_lea.vmem (%p1088_p0), %s1080_s3, %s770_s21  ;;  %s170_s28 = scalar_lea.vmem (%p1088_p0), [#allocation4], %s737_s26 }
  0x33   : > { %v186_v0 = vld [vmem:[%s173_s5] sm:$0xff] (%p1088_p0)  ;;  %v188_v1 = vld [vmem:[%s173_s5 + $0x8] sm:$0xff] (%p1088_p0)  ;;  %v190_v2 = vld [vmem:[%s173_s5 + $0x10] sm:$0xff] (%p1088_p0) }
  0x34   : > { %187 = vst [vmem:[%s170_s28] sm:$0xff] (%p1088_p0), %v186_v0  ;;  %189 = vst [vmem:[%s170_s28 + $0x8] sm:$0xff] (%p1088_p0), %v188_v1  ;;  %v192_v3 = vld [vmem:[%s173_s5 + $0x18] sm:$0xff] (%p1088_p0)  ;;  %v194_v4 = vld [vmem:[%s173_s5 + $0x40] sm:$0xff] (%p1088_p0) }
  0x35   : > { %191 = vst [vmem:[%s170_s28 + $0x10] sm:$0xff] (%p1088_p0), %v190_v2  ;;  %v196_v5 = vld [vmem:[%s173_s5 + $0x48] sm:$0xff] (%p1088_p0)  ;;  %193 = vst [vmem:[%s170_s28 + $0x18] sm:$0xff] (%p1088_p0), %v192_v3  ;;  %v198_v6 = vld [vmem:[%s173_s5 + $0x50] sm:$0xff] (%p1088_p0) }
  0x36   : > { %195 = vst [vmem:[%s170_s28 + $0x20] sm:$0xff] (%p1088_p0), %v194_v4  ;;  %197 = vst [vmem:[%s170_s28 + $0x28] sm:$0xff] (%p1088_p0), %v196_v5  ;;  %v200_v7 = vld [vmem:[%s173_s5 + $0x58] sm:$0xff] (%p1088_p0) }
  0x37   : > { %199 = vst [vmem:[%s170_s28 + $0x30] sm:$0xff] %v198_v6  ;;  %201 = vst [vmem:[%s170_s28 + $0x38] sm:$0xff] %v200_v7 }
  0x38 PF: > { %p1089_p4 = scmp.ne.s32.totalorder %s1086_s25, 0 }
  0x39   : > { %p1090_p5 = scmp.eq.s32.totalorder (!%p1089_p4), %s924_s18, 0 }
  0x3a   : > { %210 = sbr.rel (%p1089_p4) target bundleno = 320 (0x140), region = 55 }
  0x41   : > { %863 = dma.done.wait (%p1090_p5), [#allocation3], 128   ;;  %p1091_p8 = pmov %p1090_p5 }
  0x42   : > { %s217_s17 = sand.u32 1, %s868_s15   ;;  %vm295_vm0 = vcmask 1043456   ;;  %v881_v8 = vmov 0   ;;  %vm296_vm1 = vcmask 1044480   ;;  %v882_v9 = vmov 65535   ;;  %v495_v28 = vld [vmem:[%s1078_s1] sm:$0xff] }
  0x43   : > { %865 = vsyncadd (%p1091_p8), [#allocation3], 4294967168  ;;  %s993_s23 = sshll.u32 %s217_s17, 6  ;;  %355 = vmatprep.mubr.bf16.mxu0 %v881_v8  ;;  %398 = vmatprep.mubr.bf16.mxu1 %v881_v8  ;;  %v297_v10 = vsel %vm295_vm0, 4294967295, %v882_v9  ;;  %v523_v33 = vld [vmem:[%s1079_s2] sm:$0xff]  ;;  %v496_v36 = vld [vmem:[%s1078_s1 + $0x8] sm:$0xff] }
  0x44   : > { %819 = vset.pattern.permute.xlu0 %v881_v8  ;;  %820 = vset.pattern.permute.xlu1 %v881_v8  ;;  %s219_s25 = scalar_lea.vmem [#allocation4], %s993_s23  ;;  %v298_v13 = vsel %vm296_vm1, %v297_v10, 0  ;;  %v821_v34 = vld [vmem:[#allocation2] sm:$0xff]   ;;  %vm291_vm2 = vcmask 72704   ;;  %v524_v39 = vld [vmem:[%s1079_s2 + $0x8] sm:$0xff]  ;;  %s1031_s12 = scalar_lea.vmem [#allocation5], %s993_s23 }
  0x45   : > { %v246_v11 = vld [vmem:[%s219_s25] sm:$0xff]  ;;  %v247_v14 = vld [vmem:[%s219_s25 + $0x8] sm:$0xff]  ;;  %v248_v20 = vld [vmem:[%s219_s25 + $0x10] sm:$0xff]  ;;  %499 = vperm.xlu0 %819, %v495_v28   ;;  %527 = vperm.xlu1 %820, %v523_v33   ;;  %p1092_p9 = scmp.ne.s32.totalorder %s1085_s24, 0 }
  0x46   : > { %v250_v12 = vld [vmem:[%s219_s25 + $0x20] sm:$0x11]  ;;  %v251_v16 = vld [vmem:[%s219_s25 + $0x28] sm:$0x11]  ;;  %v252_v21 = vld [vmem:[%s219_s25 + $0x30] sm:$0x11] }
  0x47   : > { %v746_v15 = vcombine.high %v246_v11, %v250_v12  ;;  %v745_v17 = vcombine.low %v246_v11, %v250_v12  ;;  %v748_v18 = vcombine.high %v247_v14, %v251_v16  ;;  %v747_v19 = vcombine.low %v247_v14, %v251_v16  ;;  %v249_v26 = vld [vmem:[%s219_s25 + $0x18] sm:$0xff]  ;;  %s779_s13 = sshll.u32 (%p1092_p9), %s924_s18, 5 }
  0x48   : > { %v749_v24 = vcombine.low %v248_v20, %v252_v21  ;;  %v750_v25 = vcombine.high %v248_v20, %v252_v21  ;;  %v253_v27 = vld [vmem:[%s219_s25 + $0x38] sm:$0x11]  ;;  %s632_s21 = scalar_lea.vmem (%p1092_p9), %s1081_s4, %s779_s13 }
  0x49   : > { %v303_v22 = vand.u32 %v746_v15, %v298_v13  ;;  %v300_v23 = vand.u32 %v745_v17, %v298_v13  ;;  %v309_v29 = vand.u32 %v748_v18, %v298_v13  ;;  %v306_v30 = vand.u32 %v747_v19, %v298_v13  ;;  %504 = vperm.xlu0 %819, %v496_v36  }
  0x4a   : > { %v751_v31 = vcombine.low %v249_v26, %v253_v27  ;;  %v752_v32 = vcombine.high %v249_v26, %v253_v27  ;;  %v315_v35 = vand.u32 %v750_v25, %v298_v13  ;;  %v312_v38 = vand.u32 %v749_v24, %v298_v13  ;;  %532 = vperm.xlu1 %820, %v524_v39  }
  0x4b   : > { %323 = vmatprep.subr.bf16.mxu0 %v303_v22  ;;  %366 = vmatprep.subr.bf16.mxu1 %v309_v29 }
  0x4c   : > { %324 = vmatpush1.bf16.msra.mxu0 %v300_v23  ;;  %v321_v37 = vand.u32 %v752_v32, %v298_v13  ;;  %367 = vmatpush1.bf16.msra.mxu1 %v306_v30  ;;  %v318_v40 = vand.u32 %v751_v31, %v298_v13 }
  0x4d   : > { %409 = vmatprep.subr.bf16.mxu0 %v315_v35 }
  0x4e   : > { %452 = vmatprep.subr.bf16.mxu1 %v321_v37 }
  0x4f   : > { %753 = vmatmul.mubr.msk.bf16.vlgmr.msra.gmra.mrb[0].mxu0 %vm291_vm2, %v821_v34  ;;  %754 = vmatmul.mubr.msk.bf16.vlgmr.msra.gmra.mrb[0].mxu1 %vm291_vm2, %v821_v34 }
  0x50   : > { %410 = vmatpush1.bf16.msra.mxu0 %v312_v38  ;;  %453 = vmatpush1.bf16.msra.mxu1 %v318_v40 }
  0x51   : > { %441 = vmatprep.mubr.bf16.mxu0 %v881_v8  ;;  %484 = vmatprep.mubr.bf16.mxu1 %v881_v8 }
  0x57   : > { %755 = vmatmul.mubr.msk.bf16.vlgmr.msra.gmra.mrb[4].mxu0 %vm291_vm2, %v821_v34  ;;  %756 = vmatmul.mubr.msk.bf16.vlgmr.msra.gmra.mrb[4].mxu1 %vm291_vm2, %v821_v34 }
  0xc4   : > { %v500_v41 = vpop.permute.xlu0 %499  ;;  %v1012_v42 = vpop.permute.xlu1 %527 }
  0xc8   : > { %v1014_v43 = vpop.permute.xlu0 %504 }
  0xc9   : > { %v1016_v45 = vpop.permute.xlu1 %532 }
 0x122   : > { %v357_v44 = vpop.f32.mrb[0].mxu0  ;;  %v400_v47 = vpop.f32.mrb[0].mxu1 }
 0x123   : > { %v507_v46 = vmul.f32 %v500_v41, %v357_v44  ;;  %v359_v48 = vpop.f32.mrb[1].mxu0  ;;  %v509_v49 = vmul.f32 %v500_v41, %v400_v47  ;;  %v402_v51 = vpop.f32.mrb[1].mxu1 }
 0x124   : > { %v508_v50 = vmul.f32 %v500_v41, %v359_v48  ;;  %v361_v52 = vpop.f32.mrb[2].mxu0  ;;  %v510_v54 = vmul.f32 %v500_v41, %v402_v51  ;;  %v404_v56 = vpop.f32.mrb[2].mxu1 }
 0x125   : > { %v535_v53 = vadd.f32 %v1012_v42, %v507_v46  ;;  %v515_v55 = vmul.f32 %v1014_v43, %v361_v52  ;;  %v363_v57 = vpop.f32.mrb[3].mxu0  ;;  %v537_v58 = vadd.f32 %v1012_v42, %v509_v49  ;;  %v517_v60 = vmul.f32 %v1014_v43, %v404_v56  ;;  %v406_v62 = vpop.f32.mrb[3].mxu1 }
 0x126   : > { %v536_v59 = vadd.f32 %v1012_v42, %v508_v50  ;;  %v516_v61 = vmul.f32 %v1014_v43, %v363_v57  ;;  %v538_v0 = vadd.f32 %v1012_v42, %v510_v54  ;;  %v518_v1 = vmul.f32 %v1014_v43, %v406_v62 }
 0x127   : > { %v551_v63 = vmax.f32 %v535_v53, 0.0  ;;  %v543_v2 = vadd.f32 %v1016_v45, %v515_v55  ;;  %v553_v3 = vmax.f32 %v537_v58, 0.0  ;;  %v545_v6 = vadd.f32 %v1016_v45, %v517_v60 }
 0x128   : > { %v552_v4 = vmax.f32 %v536_v59, 0.0  ;;  %v544_v5 = vadd.f32 %v1016_v45, %v516_v61  ;;  %v554_v7 = vmax.f32 %v538_v0, 0.0  ;;  %v546_v8 = vadd.f32 %v1016_v45, %v518_v1 }
 0x129   : > { %v559_v9 = vmax.f32 %v543_v2, 0.0  ;;  %v561_v12 = vmax.f32 %v545_v6, 0.0 }
 0x12a   : > { %v771_v10 = vpack.c.bf16 %v552_v4, %v551_v63  ;;  %v560_v11 = vmax.f32 %v544_v5, 0.0  ;;  %v443_v13 = vpop.f32.mrb[4].mxu0  ;;  %v772_v14 = vpack.c.bf16 %v554_v7, %v553_v3  ;;  %v562_v15 = vmax.f32 %v546_v8, 0.0  ;;  %v486_v17 = vpop.f32.mrb[4].mxu1 }
 0x12b   : > { %v511_v16 = vmul.f32 %v500_v41, %v443_v13  ;;  %v445_v18 = vpop.f32.mrb[5].mxu0  ;;  %v513_v20 = vmul.f32 %v500_v41, %v486_v17  ;;  %v488_v22 = vpop.f32.mrb[5].mxu1 }
 0x12c   : > { %615 = vst [vmem:[%s1031_s12] sm:$0xff] %v771_v10  ;;  %v775_v19 = vpack.c.bf16 %v560_v11, %v559_v9  ;;  %v512_v21 = vmul.f32 %v500_v41, %v445_v18  ;;  %v447_v23 = vpop.f32.mrb[6].mxu0  ;;  %616 = vst [vmem:[%s1031_s12 + $0x8] sm:$0xff] %v772_v14  ;;  %v776_v24 = vpack.c.bf16 %v562_v15, %v561_v12  ;;  %v490_v28 = vpop.f32.mrb[6].mxu1 }
 0x12d   : > { %v539_v25 = vadd.f32 %v1012_v42, %v511_v16  ;;  %v514_v26 = vmul.f32 %v500_v41, %v488_v22  ;;  %v519_v27 = vmul.f32 %v1014_v43, %v447_v23  ;;  %v449_v29 = vpop.f32.mrb[7].mxu0  ;;  %v541_v30 = vadd.f32 %v1012_v42, %v513_v20  ;;  %v492_v34 = vpop.f32.mrb[7].mxu1 }
 0x12e   : > { %619 = vst [vmem:[%s1031_s12 + $0x20] sm:$0xff] %v775_v19  ;;  %v540_v31 = vadd.f32 %v1012_v42, %v512_v21  ;;  %v521_v32 = vmul.f32 %v1014_v43, %v490_v28  ;;  %v520_v33 = vmul.f32 %v1014_v43, %v449_v29  ;;  %620 = vst [vmem:[%s1031_s12 + $0x28] sm:$0xff] %v776_v24 }
 0x12f   : > { %v555_v35 = vmax.f32 %v539_v25, 0.0  ;;  %v542_v36 = vadd.f32 %v1012_v42, %v514_v26  ;;  %v547_v37 = vadd.f32 %v1016_v45, %v519_v27  ;;  %v522_v38 = vmul.f32 %v1014_v43, %v492_v34 }
 0x130   : > { %v557_v39 = vmax.f32 %v541_v30, 0.0  ;;  %v556_v40 = vmax.f32 %v540_v31, 0.0  ;;  %v549_v41 = vadd.f32 %v1016_v45, %v521_v32  ;;  %v548_v44 = vadd.f32 %v1016_v45, %v520_v33 }
 0x131   : > { %v558_v46 = vmax.f32 %v542_v36, 0.0  ;;  %v563_v47 = vmax.f32 %v547_v37, 0.0  ;;  %v550_v48 = vadd.f32 %v1016_v45, %v522_v38  ;;  %629 = sbr.rel (!%p1092_p9) target bundleno = 320 (0x140), region = 67 }
 0x132   : > { %v773_v49 = vpack.c.bf16 %v556_v40, %v555_v35  ;;  %v565_v50 = vmax.f32 %v549_v41, 0.0  ;;  %v564_v42 = vmax.f32 %v548_v44, 0.0 }
 0x133   : > { %v774_v51 = vpack.c.bf16 %v558_v46, %v557_v39  ;;  %v566_v52 = vmax.f32 %v550_v48, 0.0  ;;  %v645_v45 = vld [vmem:[%s1031_s12] sm:$0xff] (%p1092_p9)  ;;  %v647_v54 = vld [vmem:[%s1031_s12 + $0x8] sm:$0xff] (%p1092_p9) }
 0x134   : > { %617 = vst [vmem:[%s1031_s12 + $0x10] sm:$0xff] %v773_v49  ;;  %v777_v53 = vpack.c.bf16 %v564_v42, %v563_v47  ;;  %646 = vst [vmem:[%s632_s21] sm:$0xff] (%p1092_p9), %v645_v45 }
 0x135   : > { %618 = vst [vmem:[%s1031_s12 + $0x18] sm:$0xff] %v774_v51  ;;  %v778_v43 = vpack.c.bf16 %v566_v52, %v565_v50  ;;  %v653_v57 = vld [vmem:[%s1031_s12 + $0x20] sm:$0xff] (%p1092_p9)  ;;  %v655_v58 = vld [vmem:[%s1031_s12 + $0x28] sm:$0xff] (%p1092_p9)  ;;  %648 = vst [vmem:[%s632_s21 + $0x8] sm:$0xff] (%p1092_p9), %v647_v54 }
 0x136   : > { %621 = vst [vmem:[%s1031_s12 + $0x30] sm:$0xff] %v777_v53  ;;  %654 = vst [vmem:[%s632_s21 + $0x40] sm:$0xff] (%p1092_p9), %v653_v57 }
 0x137   : > { %622 = vst [vmem:[%s1031_s12 + $0x38] sm:$0xff] %v778_v43  ;;  %656 = vst [vmem:[%s632_s21 + $0x48] sm:$0xff] (%p1092_p9), %v655_v58 }
 0x13b   : > { %v649_v55 = vld [vmem:[%s1031_s12 + $0x10] sm:$0xff] }
 0x13c   : > { %v651_v56 = vld [vmem:[%s1031_s12 + $0x18] sm:$0xff]  ;;  %650 = vst [vmem:[%s632_s21 + $0x10] sm:$0xff] %v649_v55 }
 0x13d   : > { %652 = vst [vmem:[%s632_s21 + $0x18] sm:$0xff] %v651_v56  ;;  %v657_v59 = vld [vmem:[%s1031_s12 + $0x30] sm:$0xff] }
 0x13e   : > { %v659_v60 = vld [vmem:[%s1031_s12 + $0x38] sm:$0xff]  ;;  %658 = vst [vmem:[%s632_s21 + $0x50] sm:$0xff] %v657_v59 }
 0x13f   : > { %660 = vst [vmem:[%s632_s21 + $0x58] sm:$0xff] %v659_v60 }
 0x140 PF: > { %p12_p11 = scmp.ge.s32.totalorder %s927_s19, 4   ;;  %s1093_s15 = smov %s872_s16 }
 0x141   : > { %s1094_s16 = smov %s937_s22  ;;  %s1095_s17 = smov %s927_s19 }
 0x142   :  { %14 = sbr.rel (!%p12_p11) target bundleno = 2 (0x2), region = 122 }
 0x149   :  { %676 = vsyncpa [#allocation3], 1 }
 0x14a   :  { %678 = vsyncpa [#allocation3 + $0x1], 1 }

// kernel: mnist_network_adj_forward.5
= control target key start
LH: loop header
LB: loop body
LE: loop exit
PB: predicated region body
PF: predicated region fallthrough
CT: control target
= control target key end

     0   :  { %v876_v1 = vmov 0   ;;  %s1160_s3 = inlined_call_operand.vmem [shape: bf16[256,512], index: 3, kind: input, shape index: {}]   ;;  %s1161_s0 = inlined_call_operand.vmem [shape: bf16[32,256], index: 0, kind: input, shape index: {}]   ;;  %s1162_s1 = inlined_call_operand.vmem [shape: f32[32,1], index: 1, kind: input, shape index: {}]   ;;  %s1163_s2 = inlined_call_operand.vmem [shape: f32[32,1], index: 2, kind: input, shape index: {}]   ;;  %s1164_s4 = inlined_call_operand.vmem [shape: bf16[32,512], index: 4, kind: output, shape index: {}]  }
   0x1   :  { %v774_v0 = vld [vmem:[%s1160_s3 + $0x4] ss:$16 sps:$4 sm:$0xff]   ;;  %773 = vset.pattern.permute.xlu1 %v876_v1  ;;  %772 = vset.pattern.permute.xlu0 %v876_v1  ;;  %v776_v2 = vld [vmem:[%s1160_s3 + $0xc] ss:$16 sps:$4 sm:$0xff]   ;;  %v778_v3 = vld [vmem:[%s1160_s3] ss:$16 sps:$4 sm:$0xff]  }
   0x2   :  { %425 = vmatprep.subr.bf16.mxu0 %v774_v0  ;;  %v779_v4 = vld [vmem:[%s1160_s3 + $0x8] ss:$16 sps:$4 sm:$0xff]   ;;  %478 = vmatprep.subr.bf16.mxu1 %v776_v2  ;;  %v780_v5 = vld [vmem:[%s1160_s3 + $0x24] ss:$16 sps:$4 sm:$0xff]   ;;  %v782_v6 = vld [vmem:[%s1160_s3 + $0x2c] ss:$16 sps:$4 sm:$0xff]  }
   0x3   :  { %426 = vmatpush1.bf16.msra.mxu0 %v778_v3  ;;  %479 = vmatpush1.bf16.msra.mxu1 %v779_v4  ;;  %v784_v7 = vld [vmem:[%s1160_s3 + $0x20] ss:$16 sps:$4 sm:$0xff]   ;;  %v785_v8 = vld [vmem:[%s1160_s3 + $0x28] ss:$16 sps:$4 sm:$0xff]   ;;  %v786_v9 = vld [vmem:[%s1160_s3 + $0x44] ss:$16 sps:$4 sm:$0xff]  }
   0x4   :  { %427 = vmatprep.subr.bf16.mxu0 %v780_v5  ;;  %480 = vmatprep.subr.bf16.mxu1 %v782_v6  ;;  %v788_v10 = vld [vmem:[%s1160_s3 + $0x4c] ss:$16 sps:$4 sm:$0xff]   ;;  %v790_v11 = vld [vmem:[%s1160_s3 + $0x40] ss:$16 sps:$4 sm:$0xff]   ;;  %v791_v12 = vld [vmem:[%s1160_s3 + $0x48] ss:$16 sps:$4 sm:$0xff]  }
   0x5   :  { %v792_v13 = vld [vmem:[%s1160_s3 + $0x64] ss:$16 sps:$4 sm:$0xff]   ;;  %v794_v14 = vld [vmem:[%s1160_s3 + $0x6c] ss:$16 sps:$4 sm:$0xff]   ;;  %v796_v15 = vld [vmem:[%s1160_s3 + $0x60] ss:$16 sps:$4 sm:$0xff]  }
   0x6   :  { %v797_v16 = vld [vmem:[%s1160_s3 + $0x68] ss:$16 sps:$4 sm:$0xff]   ;;  %v798_v17 = vld [vmem:[%s1160_s3 + $0x84] ss:$16 sps:$4 sm:$0xff]   ;;  %v800_v18 = vld [vmem:[%s1160_s3 + $0x8c] ss:$16 sps:$4 sm:$0xff]  }
   0x7   :  { %428 = vmatpush1.bf16.msra.mxu0 %v784_v7  ;;  %481 = vmatpush1.bf16.msra.mxu1 %v785_v8  ;;  %v802_v19 = vld [vmem:[%s1160_s3 + $0x80] ss:$16 sps:$4 sm:$0xff]   ;;  %v803_v20 = vld [vmem:[%s1160_s3 + $0x88] ss:$16 sps:$4 sm:$0xff]   ;;  %v804_v21 = vld [vmem:[%s1160_s3 + $0xa4] ss:$16 sps:$4 sm:$0xff]  }
   0x8   :  { %429 = vmatprep.subr.bf16.mxu0 %v786_v9  ;;  %482 = vmatprep.subr.bf16.mxu1 %v788_v10  ;;  %v806_v22 = vld [vmem:[%s1160_s3 + $0xac] ss:$16 sps:$4 sm:$0xff]   ;;  %v808_v23 = vld [vmem:[%s1160_s3 + $0xa0] ss:$16 sps:$4 sm:$0xff]   ;;  %v809_v24 = vld [vmem:[%s1160_s3 + $0xa8] ss:$16 sps:$4 sm:$0xff]  }
   0x9   :  { %v810_v25 = vld [vmem:[%s1160_s3 + $0xc4] ss:$16 sps:$4 sm:$0xff]   ;;  %v812_v26 = vld [vmem:[%s1160_s3 + $0xcc] ss:$16 sps:$4 sm:$0xff]   ;;  %v814_v27 = vld [vmem:[%s1160_s3 + $0xc0] ss:$16 sps:$4 sm:$0xff]  }
   0xa   :  { %v815_v28 = vld [vmem:[%s1160_s3 + $0xc8] ss:$16 sps:$4 sm:$0xff]   ;;  %v816_v29 = vld [vmem:[%s1160_s3 + $0xe4] ss:$16 sps:$4 sm:$0xff]   ;;  %v818_v30 = vld [vmem:[%s1160_s3 + $0xec] ss:$16 sps:$4 sm:$0xff]  }
   0xb   :  { %430 = vmatpush1.bf16.msra.mxu0 %v790_v11  ;;  %483 = vmatpush1.bf16.msra.mxu1 %v791_v12  ;;  %v820_v31 = vld [vmem:[%s1160_s3 + $0xe0] ss:$16 sps:$4 sm:$0xff]   ;;  %v821_v32 = vld [vmem:[%s1160_s3 + $0xe8] ss:$16 sps:$4 sm:$0xff]   ;;  %v822_v33 = vld [vmem:[%s1160_s3 + $0x104] ss:$16 sps:$4 sm:$0xff]  }
   0xc   :  { %431 = vmatprep.subr.bf16.mxu0 %v792_v13  ;;  %484 = vmatprep.subr.bf16.mxu1 %v794_v14  ;;  %v824_v34 = vld [vmem:[%s1160_s3 + $0x10c] ss:$16 sps:$4 sm:$0xff]   ;;  %v826_v35 = vld [vmem:[%s1160_s3 + $0x100] ss:$16 sps:$4 sm:$0xff]   ;;  %v827_v36 = vld [vmem:[%s1160_s3 + $0x108] ss:$16 sps:$4 sm:$0xff]  }
   0xd   :  { %v828_v37 = vld [vmem:[%s1160_s3 + $0x124] ss:$16 sps:$4 sm:$0xff]   ;;  %v830_v38 = vld [vmem:[%s1160_s3 + $0x12c] ss:$16 sps:$4 sm:$0xff]   ;;  %v832_v39 = vld [vmem:[%s1160_s3 + $0x120] ss:$16 sps:$4 sm:$0xff]  }
   0xe   :  { %v833_v40 = vld [vmem:[%s1160_s3 + $0x128] ss:$16 sps:$4 sm:$0xff]   ;;  %v834_v41 = vld [vmem:[%s1160_s3 + $0x144] ss:$16 sps:$4 sm:$0xff]   ;;  %v836_v42 = vld [vmem:[%s1160_s3 + $0x14c] ss:$16 sps:$4 sm:$0xff]  }
   0xf   :  { %432 = vmatpush1.bf16.msra.mxu0 %v796_v15  ;;  %485 = vmatpush1.bf16.msra.mxu1 %v797_v16  ;;  %v838_v43 = vld [vmem:[%s1160_s3 + $0x140] ss:$16 sps:$4 sm:$0xff]   ;;  %v839_v44 = vld [vmem:[%s1160_s3 + $0x148] ss:$16 sps:$4 sm:$0xff]   ;;  %v840_v45 = vld [vmem:[%s1160_s3 + $0x164] ss:$16 sps:$4 sm:$0xff]  }
  0x10   :  { %433 = vmatprep.subr.bf16.mxu0 %v798_v17  ;;  %486 = vmatprep.subr.bf16.mxu1 %v800_v18  ;;  %v842_v46 = vld [vmem:[%s1160_s3 + $0x16c] ss:$16 sps:$4 sm:$0xff]   ;;  %v844_v47 = vld [vmem:[%s1160_s3 + $0x160] ss:$16 sps:$4 sm:$0xff]   ;;  %v845_v48 = vld [vmem:[%s1160_s3 + $0x168] ss:$16 sps:$4 sm:$0xff]  }
  0x11   :  { %v872_v49 = vld [vmem:[%s1161_s0 + $0x4] ss:$8 sps:$4 sm:$0xff]   ;;  %v533_v52 = vld [vmem:[%s1162_s1 + $0x10] sm:$0xff]  ;;  %v851_v55 = vld [vmem:[%s1160_s3 + $0x188] ss:$16 sps:$4 sm:$0xff]  }
  0x12   :  { %v846_v50 = vld [vmem:[%s1160_s3 + $0x184] ss:$16 sps:$4 sm:$0xff]   ;;  %v848_v51 = vld [vmem:[%s1160_s3 + $0x18c] ss:$16 sps:$4 sm:$0xff]   ;;  %457 = vmatprep.mubr.bf16.mxu0 %v872_v49  ;;  %510 = vmatprep.mubr.bf16.mxu1 %v872_v49  ;;  %v850_v54 = vld [vmem:[%s1160_s3 + $0x180] ss:$16 sps:$4 sm:$0xff]  }
  0x13   :  { %434 = vmatpush1.bf16.msra.mxu0 %v802_v19  ;;  %487 = vmatpush1.bf16.msra.mxu1 %v803_v20  ;;  %v531_v53 = vld [vmem:[%s1162_s1] sm:$0xff]  ;;  %v534_v56 = vld [vmem:[%s1162_s1 + $0x18] sm:$0xff]  ;;  %v532_v57 = vld [vmem:[%s1162_s1 + $0x8] sm:$0xff] }
  0x14   :  { %435 = vmatprep.subr.bf16.mxu0 %v804_v21  ;;  %488 = vmatprep.subr.bf16.mxu1 %v806_v22  ;;  %v852_v58 = vld [vmem:[%s1160_s3 + $0x1a4] ss:$16 sps:$4 sm:$0xff]   ;;  %v854_v59 = vld [vmem:[%s1160_s3 + $0x1ac] ss:$16 sps:$4 sm:$0xff]   ;;  %v856_v60 = vld [vmem:[%s1160_s3 + $0x1a0] ss:$16 sps:$4 sm:$0xff]  }
  0x15   :  { %547 = vperm.xlu1 %773, %v533_v52   ;;  %537 = vperm.xlu0 %772, %v531_v53   ;;  %v857_v61 = vld [vmem:[%s1160_s3 + $0x1a8] ss:$16 sps:$4 sm:$0xff]   ;;  %v571_v63 = vld [vmem:[%s1163_s2] sm:$0xff]  ;;  %v860_v1 = vld [vmem:[%s1160_s3 + $0x1cc] ss:$16 sps:$4 sm:$0xff]  }
  0x16   :  { %v572_v62 = vld [vmem:[%s1163_s2 + $0x8] sm:$0xff]  ;;  %v858_v0 = vld [vmem:[%s1160_s3 + $0x1c4] ss:$16 sps:$4 sm:$0xff]   ;;  %v862_v2 = vld [vmem:[%s1160_s3 + $0x1c0] ss:$16 sps:$4 sm:$0xff]  }
  0x17   :  { %436 = vmatpush1.bf16.msra.mxu0 %v808_v23  ;;  %489 = vmatpush1.bf16.msra.mxu1 %v809_v24  ;;  %v863_v3 = vld [vmem:[%s1160_s3 + $0x1c8] ss:$16 sps:$4 sm:$0xff]   ;;  %v573_v5 = vld [vmem:[%s1163_s2 + $0x10] sm:$0xff]  ;;  %v866_v7 = vld [vmem:[%s1160_s3 + $0x1ec] ss:$16 sps:$4 sm:$0xff]  }
  0x18   :  { %437 = vmatprep.subr.bf16.mxu0 %v810_v25  ;;  %490 = vmatprep.subr.bf16.mxu1 %v812_v26  ;;  %v574_v4 = vld [vmem:[%s1163_s2 + $0x18] sm:$0xff]  ;;  %v864_v6 = vld [vmem:[%s1160_s3 + $0x1e4] ss:$16 sps:$4 sm:$0xff]   ;;  %v868_v8 = vld [vmem:[%s1160_s3 + $0x1e0] ss:$16 sps:$4 sm:$0xff]  }
  0x19   :  { %552 = vperm.xlu1 %773, %v534_v56   ;;  %542 = vperm.xlu0 %772, %v532_v57   ;;  %v869_v9 = vld [vmem:[%s1160_s3 + $0x1e8] ss:$16 sps:$4 sm:$0xff]   ;;  %v873_v11 = vld [vmem:[%s1161_s0 + $0x14] ss:$8 sps:$4 sm:$0xff]  }
  0x1a   :  { %v870_v10 = vld [vmem:[%s1161_s0] ss:$8 sps:$4 sm:$0xff]   ;;  %v875_v12 = vld [vmem:[%s1161_s0 + $0x10] ss:$8 sps:$4 sm:$0xff]  }
  0x1b   :  { %438 = vmatpush1.bf16.msra.mxu0 %v814_v27  ;;  %491 = vmatpush1.bf16.msra.mxu1 %v815_v28 }
  0x1c   :  { %439 = vmatprep.subr.bf16.mxu0 %v816_v29  ;;  %492 = vmatprep.subr.bf16.mxu1 %v818_v30 }
  0x1d   :  { %582 = vperm.xlu1 %773, %v572_v62   ;;  %577 = vperm.xlu0 %772, %v571_v63  }
  0x1f   :  { %440 = vmatpush1.bf16.msra.mxu0 %v820_v31  ;;  %493 = vmatpush1.bf16.msra.mxu1 %v821_v32 }
  0x20   :  { %441 = vmatprep.subr.bf16.mxu0 %v822_v33  ;;  %494 = vmatprep.subr.bf16.mxu1 %v824_v34 }
  0x21   :  { %592 = vperm.xlu1 %773, %v574_v4   ;;  %587 = vperm.xlu0 %772, %v573_v5  }
  0x23   :  { %442 = vmatpush1.bf16.msra.mxu0 %v826_v35  ;;  %495 = vmatpush1.bf16.msra.mxu1 %v827_v36 }
  0x24   :  { %443 = vmatprep.subr.bf16.mxu0 %v828_v37  ;;  %496 = vmatprep.subr.bf16.mxu1 %v830_v38 }
  0x27   :  { %444 = vmatpush1.bf16.msra.mxu0 %v832_v39  ;;  %497 = vmatpush1.bf16.msra.mxu1 %v833_v40 }
  0x28   :  { %445 = vmatprep.subr.bf16.mxu0 %v834_v41  ;;  %498 = vmatprep.subr.bf16.mxu1 %v836_v42 }
  0x2b   :  { %446 = vmatpush1.bf16.msra.mxu0 %v838_v43  ;;  %499 = vmatpush1.bf16.msra.mxu1 %v839_v44 }
  0x2c   :  { %447 = vmatprep.subr.bf16.mxu0 %v840_v45  ;;  %500 = vmatprep.subr.bf16.mxu1 %v842_v46 }
  0x2f   :  { %448 = vmatpush1.bf16.msra.mxu0 %v844_v47  ;;  %501 = vmatpush1.bf16.msra.mxu1 %v845_v48 }
  0x30   :  { %449 = vmatprep.subr.bf16.mxu0 %v846_v50  ;;  %502 = vmatprep.subr.bf16.mxu1 %v848_v51 }
  0x33   :  { %450 = vmatpush1.bf16.msra.mxu0 %v850_v54  ;;  %503 = vmatpush1.bf16.msra.mxu1 %v851_v55 }
  0x34   :  { %451 = vmatprep.subr.bf16.mxu0 %v852_v58  ;;  %504 = vmatprep.subr.bf16.mxu1 %v854_v59 }
  0x37   :  { %452 = vmatpush1.bf16.msra.mxu0 %v856_v60  ;;  %505 = vmatpush1.bf16.msra.mxu1 %v857_v61 }
  0x38   :  { %453 = vmatprep.subr.bf16.mxu0 %v858_v0  ;;  %506 = vmatprep.subr.bf16.mxu1 %v860_v1 }
  0x3b   :  { %454 = vmatpush1.bf16.msra.mxu0 %v862_v2  ;;  %507 = vmatpush1.bf16.msra.mxu1 %v863_v3 }
  0x3c   :  { %455 = vmatprep.subr.bf16.mxu0 %v864_v6  ;;  %508 = vmatprep.subr.bf16.mxu1 %v866_v7 }
  0x3f   :  { %456 = vmatpush1.bf16.msra.mxu0 %v868_v8  ;;  %509 = vmatpush1.bf16.msra.mxu1 %v869_v9 }
  0x42   :  { %458 = vmatmul.mubr.bf16.vlgmr.msra.gmra.mrb[0].mxu0 %v870_v10  ;;  %511 = vmatmul.mubr.bf16.vlgmr.msra.gmra.mrb[0].mxu1 %v870_v10 }
  0x43   :  { %467 = vmatprep.mubr.bf16.mxu0 %v873_v11  ;;  %520 = vmatprep.mubr.bf16.mxu1 %v873_v11 }
  0x4a   :  { %468 = vmatmul.mubr.bf16.gmra.mrb[4].mxu0 %v875_v12  ;;  %521 = vmatmul.mubr.bf16.gmra.mrb[4].mxu1 %v875_v12 }
  0x94   :  { %v538_v13 = vpop.permute.xlu0 %537  ;;  %v548_v14 = vpop.permute.xlu1 %547 }
  0x98   :  { %v543_v15 = vpop.permute.xlu0 %542  ;;  %v1130_v16 = vpop.permute.xlu1 %552 }
  0x9c   :  { %v578_v17 = vpop.permute.xlu0 %577  ;;  %v583_v34 = vpop.permute.xlu1 %582 }
  0xa0   :  { %v588_v47 = vpop.permute.xlu0 %587  ;;  %v593_v8 = vpop.permute.xlu1 %592 }
 0x115   :  { %v459_v18 = vpop.f32.mrb[0].mxu0  ;;  %v512_v19 = vpop.f32.mrb[0].mxu1 }
 0x116   :  { %v555_v20 = vmul.f32 %v538_v13, %v459_v18  ;;  %v557_v21 = vmul.f32 %v538_v13, %v512_v19  ;;  %v461_v22 = vpop.f32.mrb[1].mxu0  ;;  %v514_v23 = vpop.f32.mrb[1].mxu1 }
 0x117   :  { %v556_v24 = vmul.f32 %v538_v13, %v461_v22  ;;  %v558_v25 = vmul.f32 %v538_v13, %v514_v23  ;;  %v463_v26 = vpop.f32.mrb[2].mxu0  ;;  %v516_v27 = vpop.f32.mrb[2].mxu1 }
 0x118   :  { %v595_v28 = vadd.f32 %v578_v17, %v555_v20  ;;  %v597_v29 = vadd.f32 %v578_v17, %v557_v21  ;;  %v559_v30 = vmul.f32 %v543_v15, %v463_v26  ;;  %v561_v31 = vmul.f32 %v543_v15, %v516_v27  ;;  %v465_v32 = vpop.f32.mrb[3].mxu0  ;;  %v518_v33 = vpop.f32.mrb[3].mxu1 }
 0x119   :  { %v596_v35 = vadd.f32 %v578_v17, %v556_v24  ;;  %v598_v36 = vadd.f32 %v578_v17, %v558_v25  ;;  %v560_v37 = vmul.f32 %v543_v15, %v465_v32  ;;  %v562_v38 = vmul.f32 %v543_v15, %v518_v33 }
 0x11a   :  { %v611_v39 = vmax.f32 %v595_v28, 0.0  ;;  %v613_v40 = vmax.f32 %v597_v29, 0.0  ;;  %v599_v41 = vadd.f32 %v583_v34, %v559_v30  ;;  %v601_v42 = vadd.f32 %v583_v34, %v561_v31 }
 0x11b   :  { %v612_v43 = vmax.f32 %v596_v35, 0.0  ;;  %v614_v44 = vmax.f32 %v598_v36, 0.0  ;;  %v600_v45 = vadd.f32 %v583_v34, %v560_v37  ;;  %v602_v46 = vadd.f32 %v583_v34, %v562_v38 }
 0x11c   :  { %v615_v48 = vmax.f32 %v599_v41, 0.0  ;;  %v617_v49 = vmax.f32 %v601_v42, 0.0 }
 0x11d   :  { %v763_v50 = vpack.c.bf16 %v612_v43, %v611_v39  ;;  %v764_v51 = vpack.c.bf16 %v614_v44, %v613_v40  ;;  %v616_v52 = vmax.f32 %v600_v45, 0.0  ;;  %v618_v53 = vmax.f32 %v602_v46, 0.0  ;;  %v469_v54 = vpop.f32.mrb[4].mxu0  ;;  %v522_v55 = vpop.f32.mrb[4].mxu1 }
 0x11e   :  { %v563_v56 = vmul.f32 %v548_v14, %v469_v54  ;;  %v565_v57 = vmul.f32 %v548_v14, %v522_v55  ;;  %v471_v58 = vpop.f32.mrb[5].mxu0  ;;  %v524_v59 = vpop.f32.mrb[5].mxu1 }
 0x11f   :  { %675 = vst [vmem:[%s1164_s4] sm:$0xff] %v763_v50  ;;  %676 = vst [vmem:[%s1164_s4 + $0x8] sm:$0xff] %v764_v51  ;;  %v765_v60 = vpack.c.bf16 %v616_v52, %v615_v48  ;;  %v766_v61 = vpack.c.bf16 %v618_v53, %v617_v49  ;;  %v564_v62 = vmul.f32 %v548_v14, %v471_v58  ;;  %v473_v0 = vpop.f32.mrb[6].mxu0  ;;  %v526_v1 = vpop.f32.mrb[6].mxu1 }
 0x120   :  { %v566_v63 = vmul.f32 %v548_v14, %v524_v59  ;;  %v603_v2 = vadd.f32 %v588_v47, %v563_v56  ;;  %v605_v3 = vadd.f32 %v588_v47, %v565_v57  ;;  %v567_v4 = vmul.f32 %v1130_v16, %v473_v0  ;;  %v475_v6 = vpop.f32.mrb[7].mxu0  ;;  %v528_v7 = vpop.f32.mrb[7].mxu1 }
 0x121   :  { %v569_v5 = vmul.f32 %v1130_v16, %v526_v1  ;;  %677 = vst [vmem:[%s1164_s4 + $0x10] sm:$0xff] %v765_v60  ;;  %678 = vst [vmem:[%s1164_s4 + $0x18] sm:$0xff] %v766_v61  ;;  %v604_v9 = vadd.f32 %v588_v47, %v564_v62  ;;  %v568_v11 = vmul.f32 %v1130_v16, %v475_v6 }
 0x122   :  { %v606_v10 = vadd.f32 %v588_v47, %v566_v63  ;;  %v570_v12 = vmul.f32 %v1130_v16, %v528_v7  ;;  %v619_v13 = vmax.f32 %v603_v2, 0.0  ;;  %v621_v14 = vmax.f32 %v605_v3, 0.0 }
 0x123   :  { %v607_v15 = vadd.f32 %v593_v8, %v567_v4  ;;  %v609_v17 = vadd.f32 %v593_v8, %v569_v5  ;;  %v620_v18 = vmax.f32 %v604_v9, 0.0  ;;  %v608_v20 = vadd.f32 %v593_v8, %v568_v11 }
 0x124   :  { %v622_v19 = vmax.f32 %v606_v10, 0.0  ;;  %v610_v21 = vadd.f32 %v593_v8, %v570_v12 }
 0x125   :  { %v623_v22 = vmax.f32 %v607_v15, 0.0  ;;  %v625_v23 = vmax.f32 %v609_v17, 0.0  ;;  %v767_v24 = vpack.c.bf16 %v620_v18, %v619_v13  ;;  %v624_v26 = vmax.f32 %v608_v20, 0.0 }
 0x126   :  { %v768_v25 = vpack.c.bf16 %v622_v19, %v621_v14  ;;  %v626_v27 = vmax.f32 %v610_v21, 0.0 }
 0x127   :  { %679 = vst [vmem:[%s1164_s4 + $0x20] sm:$0xff] %v767_v24  ;;  %v769_v16 = vpack.c.bf16 %v624_v26, %v623_v22 }
 0x128   :  { %680 = vst [vmem:[%s1164_s4 + $0x28] sm:$0xff] %v768_v25  ;;  %v770_v28 = vpack.c.bf16 %v626_v27, %v625_v23 }
 0x129   :  { %681 = vst [vmem:[%s1164_s4 + $0x30] sm:$0xff] %v769_v16 }
 0x12a   :  { %682 = vst [vmem:[%s1164_s4 + $0x38] sm:$0xff] %v770_v28 }

// kernel: mnist_network_adj_forward.6
= control target key start
LH: loop header
LB: loop body
LE: loop exit
PB: predicated region body
PF: predicated region fallthrough
CT: control target
= control target key end

     0   :  { %v666_v1 = vmov 0   ;;  %s842_s3 = inlined_call_operand.vmem [shape: bf16[512,128], index: 3, kind: input, shape index: {}]   ;;  %s843_s0 = inlined_call_operand.vmem [shape: bf16[32,512], index: 0, kind: input, shape index: {}]   ;;  %s844_s1 = inlined_call_operand.vmem [shape: f32[32,1], index: 1, kind: input, shape index: {}]   ;;  %s845_s2 = inlined_call_operand.vmem [shape: f32[32,1], index: 2, kind: input, shape index: {}]   ;;  %s846_s4 = inlined_call_operand.vmem [shape: bf16[32,128], index: 4, kind: output, shape index: {}]  }
   0x1   :  { %v622_v0 = vld [vmem:[%s842_s3 + $0x40] sm:$0xff]   ;;  %621 = vset.pattern.permute.xlu1 %v666_v1  ;;  %620 = vset.pattern.permute.xlu0 %v666_v1  ;;  %v626_v5 = vld [vmem:[%s842_s3 + $0x48] sm:$0xff]   ;;  %v630_v9 = vld [vmem:[%s842_s3 + $0x50] sm:$0xff]  }
   0x2   :  { %v623_v2 = vld [vmem:[%s842_s3 + $0xc0] sm:$0xff]   ;;  %563 = vmatprep.subr.bf16.mxu0 %v622_v0  ;;  %v627_v6 = vld [vmem:[%s842_s3 + $0xc8] sm:$0xff]   ;;  %v631_v10 = vld [vmem:[%s842_s3 + $0xd0] sm:$0xff]  }
   0x3   :  { %v624_v3 = vld [vmem:[%s842_s3] sm:$0xff]   ;;  %591 = vmatprep.subr.bf16.mxu1 %v623_v2  ;;  %v628_v7 = vld [vmem:[%s842_s3 + $0x8] sm:$0xff]   ;;  %v632_v11 = vld [vmem:[%s842_s3 + $0x10] sm:$0xff]  }
   0x4   :  { %v625_v4 = vld [vmem:[%s842_s3 + $0x80] sm:$0xff]   ;;  %564 = vmatpush3.bf16.msra.mxu0 %v624_v3  ;;  %v629_v8 = vld [vmem:[%s842_s3 + $0x88] sm:$0xff]   ;;  %v633_v12 = vld [vmem:[%s842_s3 + $0x90] sm:$0xff]  }
   0x5   :  { %592 = vmatpush3.bf16.msra.mxu1 %v625_v4  ;;  %565 = vmatprep.subr.bf16.mxu0 %v626_v5  ;;  %v634_v13 = vld [vmem:[%s842_s3 + $0x58] sm:$0xff]   ;;  %v638_v17 = vld [vmem:[%s842_s3 + $0x60] sm:$0xff]   ;;  %v642_v21 = vld [vmem:[%s842_s3 + $0x68] sm:$0xff]  }
   0x6   :  { %593 = vmatprep.subr.bf16.mxu1 %v627_v6  ;;  %v635_v14 = vld [vmem:[%s842_s3 + $0xd8] sm:$0xff]   ;;  %v639_v18 = vld [vmem:[%s842_s3 + $0xe0] sm:$0xff]   ;;  %v643_v22 = vld [vmem:[%s842_s3 + $0xe8] sm:$0xff]  }
   0x7   :  { %v636_v15 = vld [vmem:[%s842_s3 + $0x18] sm:$0xff]   ;;  %v640_v19 = vld [vmem:[%s842_s3 + $0x20] sm:$0xff]   ;;  %v644_v23 = vld [vmem:[%s842_s3 + $0x28] sm:$0xff]  }
   0x8   :  { %566 = vmatpush3.bf16.msra.mxu0 %v628_v7  ;;  %v637_v16 = vld [vmem:[%s842_s3 + $0x98] sm:$0xff]   ;;  %v641_v20 = vld [vmem:[%s842_s3 + $0xa0] sm:$0xff]   ;;  %v645_v24 = vld [vmem:[%s842_s3 + $0xa8] sm:$0xff]  }
   0x9   :  { %594 = vmatpush3.bf16.msra.mxu1 %v629_v8  ;;  %567 = vmatprep.subr.bf16.mxu0 %v630_v9  ;;  %v646_v25 = vld [vmem:[%s842_s3 + $0x70] sm:$0xff]   ;;  %v650_v29 = vld [vmem:[%s842_s3 + $0x78] sm:$0xff]   ;;  %v420_v40 = vld [vmem:[%s844_s1] sm:$0xff] }
   0xa   :  { %595 = vmatprep.subr.bf16.mxu1 %v631_v10  ;;  %v647_v26 = vld [vmem:[%s842_s3 + $0xf0] sm:$0xff]   ;;  %v651_v30 = vld [vmem:[%s842_s3 + $0xf8] sm:$0xff]   ;;  %426 = vperm.xlu0 %620, %v420_v40   ;;  %v421_v43 = vld [vmem:[%s844_s1 + $0x8] sm:$0xff] }
   0xb   :  { %v648_v27 = vld [vmem:[%s842_s3 + $0x30] sm:$0xff]   ;;  %v652_v31 = vld [vmem:[%s842_s3 + $0x38] sm:$0xff]   ;;  %v449_v45 = vld [vmem:[%s845_s2 + $0x8] sm:$0xff] }
   0xc   :  { %568 = vmatpush3.bf16.msra.mxu0 %v632_v11  ;;  %v649_v28 = vld [vmem:[%s842_s3 + $0xb0] sm:$0xff]   ;;  %v653_v32 = vld [vmem:[%s842_s3 + $0xb8] sm:$0xff]   ;;  %v448_v46 = vld [vmem:[%s845_s2] sm:$0xff] }
   0xd   :  { %596 = vmatpush3.bf16.msra.mxu1 %v633_v12  ;;  %569 = vmatprep.subr.bf16.mxu0 %v634_v13  ;;  %v654_v33 = vld [vmem:[%s843_s0] ss:$16 sps:$4 sm:$0xff]   ;;  %v656_v34 = vld [vmem:[%s843_s0 + $0x4] ss:$16 sps:$4 sm:$0xff]   ;;  %v657_v35 = vld [vmem:[%s843_s0 + $0x8] ss:$16 sps:$4 sm:$0xff]  }
   0xe   :  { %597 = vmatprep.subr.bf16.mxu1 %v635_v14  ;;  %v659_v36 = vld [vmem:[%s843_s0 + $0xc] ss:$16 sps:$4 sm:$0xff]   ;;  %354 = vmatprep.mubr.bf16.mxu0 %v656_v34  ;;  %v660_v37 = vld [vmem:[%s843_s0 + $0x24] ss:$16 sps:$4 sm:$0xff]   ;;  %v664_v42 = vld [vmem:[%s843_s0 + $0x20] ss:$16 sps:$4 sm:$0xff]  }
   0xf   :  { %403 = vmatprep.mubr.bf16.mxu1 %v659_v36  ;;  %v662_v38 = vld [vmem:[%s843_s0 + $0x2c] ss:$16 sps:$4 sm:$0xff]   ;;  %v422_v39 = vld [vmem:[%s844_s1 + $0x10] sm:$0xff]  ;;  %v665_v44 = vld [vmem:[%s843_s0 + $0x28] ss:$16 sps:$4 sm:$0xff]   ;;  %431 = vperm.xlu0 %620, %v421_v43  }
  0x10   :  { %570 = vmatpush3.bf16.msra.mxu0 %v636_v15  ;;  %436 = vperm.xlu1 %621, %v422_v39   ;;  %v423_v41 = vld [vmem:[%s844_s1 + $0x18] sm:$0xff]  ;;  %v450_v48 = vld [vmem:[%s845_s2 + $0x10] sm:$0xff] }
  0x11   :  { %598 = vmatpush3.bf16.msra.mxu1 %v637_v16  ;;  %571 = vmatprep.subr.bf16.mxu0 %v638_v17  ;;  %v451_v47 = vld [vmem:[%s845_s2 + $0x18] sm:$0xff] }
  0x12   :  { %599 = vmatprep.subr.bf16.mxu1 %v639_v18 }
  0x13   :  { %454 = vperm.xlu0 %620, %v448_v46  }
  0x14   :  { %572 = vmatpush3.bf16.msra.mxu0 %v640_v19  ;;  %441 = vperm.xlu1 %621, %v423_v41  }
  0x15   :  { %600 = vmatpush3.bf16.msra.mxu1 %v641_v20  ;;  %573 = vmatprep.subr.bf16.mxu0 %v642_v21 }
  0x16   :  { %601 = vmatprep.subr.bf16.mxu1 %v643_v22 }
  0x17   :  { %464 = vperm.xlu0 %620, %v450_v48  }
  0x18   :  { %574 = vmatpush3.bf16.msra.mxu0 %v644_v23  ;;  %459 = vperm.xlu1 %621, %v449_v45  }
  0x19   :  { %602 = vmatpush3.bf16.msra.mxu1 %v645_v24  ;;  %575 = vmatprep.subr.bf16.mxu0 %v646_v25 }
  0x1a   :  { %603 = vmatprep.subr.bf16.mxu1 %v647_v26 }
  0x1c   :  { %576 = vmatpush3.bf16.msra.mxu0 %v648_v27  ;;  %469 = vperm.xlu1 %621, %v451_v47  }
  0x1d   :  { %604 = vmatpush3.bf16.msra.mxu1 %v649_v28  ;;  %577 = vmatprep.subr.bf16.mxu0 %v650_v29 }
  0x1e   :  { %605 = vmatprep.subr.bf16.mxu1 %v651_v30 }
  0x20   :  { %578 = vmatpush3.bf16.msra.mxu0 %v652_v31 }
  0x21   :  { %606 = vmatpush3.bf16.msra.mxu1 %v653_v32 }
  0x23   :  { %355 = vmatmul.mubr.bf16.vlgmr.msra.gmra.mrb[0].mxu0 %v654_v33 }
  0x24   :  { %404 = vmatmul.mubr.bf16.vlgmr.msra.gmra.mrb[0].mxu1 %v657_v35  ;;  %362 = vmatprep.mubr.bf16.mxu0 %v660_v37 }
  0x25   :  { %411 = vmatprep.mubr.bf16.mxu1 %v662_v38 }
  0x2b   :  { %363 = vmatmul.mubr.bf16.gmra.mrb[4].mxu0 %v664_v42 }
  0x2c   :  { %412 = vmatmul.mubr.bf16.gmra.mrb[4].mxu1 %v665_v44 }
  0x89   :  { %v427_v50 = vpop.permute.xlu0 %426 }
  0x8e   :  { %v432_v52 = vpop.permute.xlu0 %431 }
  0x8f   :  { %v437_v49 = vpop.permute.xlu1 %436 }
  0x92   :  { %v455_v5 = vpop.permute.xlu0 %454 }
  0x93   :  { %v442_v51 = vpop.permute.xlu1 %441 }
  0x96   :  { %v465_v27 = vpop.permute.xlu0 %464 }
  0x97   :  { %v460_v2 = vpop.permute.xlu1 %459 }
  0x9b   :  { %v470_v30 = vpop.permute.xlu1 %469 }
  0xf6   :  { %v579_v53 = vpop.f32.mrb[0].mxu0 }
  0xf7   :  { %v607_v54 = vpop.f32.mrb[0].mxu1  ;;  %v580_v55 = vpop.f32.mrb[1].mxu0 }
  0xf8   :  { %v581_v56 = vadd.f32 %v580_v55, %v579_v53  ;;  %v608_v57 = vpop.f32.mrb[1].mxu1  ;;  %v582_v58 = vpop.f32.mrb[2].mxu0 }
  0xf9   :  { %v609_v59 = vadd.f32 %v608_v57, %v607_v54  ;;  %v610_v60 = vpop.f32.mrb[2].mxu1  ;;  %v583_v61 = vpop.f32.mrb[3].mxu0 }
  0xfa   :  { %v584_v62 = vadd.f32 %v583_v61, %v582_v58  ;;  %v611_v63 = vpop.f32.mrb[3].mxu1 }
  0xfb   :  { %v406_v0 = vadd.f32 %v609_v59, %v581_v56  ;;  %v612_v1 = vadd.f32 %v611_v63, %v610_v60 }
  0xfd   :  { %v444_v3 = vmul.f32 %v427_v50, %v406_v0  ;;  %v409_v4 = vadd.f32 %v612_v1, %v584_v62 }
  0xfe   :  { %v585_v6 = vpop.f32.mrb[4].mxu0 }
  0xff   :  { %v472_v7 = vadd.f32 %v455_v5, %v444_v3  ;;  %v445_v8 = vmul.f32 %v432_v52, %v409_v4  ;;  %v613_v9 = vpop.f32.mrb[4].mxu1  ;;  %v586_v10 = vpop.f32.mrb[5].mxu0 }
 0x100   :  { %v587_v11 = vadd.f32 %v586_v10, %v585_v6  ;;  %v614_v12 = vpop.f32.mrb[5].mxu1  ;;  %v588_v13 = vpop.f32.mrb[6].mxu0 }
 0x101   :  { %v473_v14 = vadd.f32 %v460_v2, %v445_v8  ;;  %v615_v15 = vadd.f32 %v614_v12, %v613_v9  ;;  %v616_v16 = vpop.f32.mrb[6].mxu1  ;;  %v589_v17 = vpop.f32.mrb[7].mxu0  ;;  %v476_v20 = vmax.f32 %v472_v7, 0.0 }
 0x102   :  { %v590_v18 = vadd.f32 %v589_v17, %v588_v13  ;;  %v617_v19 = vpop.f32.mrb[7].mxu1 }
 0x103   :  { %v477_v21 = vmax.f32 %v473_v14, 0.0  ;;  %v414_v22 = vadd.f32 %v615_v15, %v587_v11  ;;  %v618_v23 = vadd.f32 %v617_v19, %v616_v16 }
 0x105   :  { %v555_v24 = vpack.c.bf16 %v477_v21, %v476_v20  ;;  %v446_v25 = vmul.f32 %v437_v49, %v414_v22  ;;  %v417_v26 = vadd.f32 %v618_v23, %v590_v18 }
 0x107   :  { %556 = vst [vmem:[%s846_s4] sm:$0xff] %v555_v24   ;;  %v474_v28 = vadd.f32 %v465_v27, %v446_v25  ;;  %v447_v29 = vmul.f32 %v442_v51, %v417_v26 }
 0x109   :  { %v475_v31 = vadd.f32 %v470_v30, %v447_v29  ;;  %v478_v32 = vmax.f32 %v474_v28, 0.0 }
 0x10b   :  { %v479_v33 = vmax.f32 %v475_v31, 0.0 }
 0x10d   :  { %v560_v34 = vpack.c.bf16 %v479_v33, %v478_v32 }
 0x10f   :  { %562 = vst [vmem:[%s846_s4 + $0x8] sm:$0xff] %v560_v34  }

// kernel: mnist_network_adj_forward.7
= control target key start
LH: loop header
LB: loop body
LE: loop exit
PB: predicated region body
PF: predicated region fallthrough
CT: control target
= control target key end

     0   :  { %vm1695_vm0 = vmmov 0   ;;  %vm860_vm1 = vcmask 261120   ;;  %s2082_s0 = inlined_call_operand.vmem [shape: bf16[1568,128], index: 0, kind: input, shape index: {}]   ;;  %s2083_s5 = inlined_call_operand.vmem [shape: bf16[8,1568], index: 5, kind: input, shape index: {}]   ;;  %s2084_s3 = inlined_call_operand.vmem [shape: bf16[128,128], index: 3, kind: input, shape index: {}]   ;;  %s2085_s1 = inlined_call_operand.vmem [shape: f32[1,128], index: 1, kind: input, shape index: {}]   ;;  %s2086_s2 = inlined_call_operand.vmem [shape: f32[1,128], index: 2, kind: input, shape index: {}]   ;;  %s2087_s4 = inlined_call_operand.vmem [shape: f32[1,128], index: 4, kind: input, shape index: {}]   ;;  %s2088_s6 = inlined_call_operand.vmem [shape: f32[8,128], index: 6, kind: output, shape index: {}]  }
   0x1   :  { %v1575_v0 = vld [vmem:[%s2082_s0 + $0x40] sm:$0xff]   ;;  %v1579_v4 = vld [vmem:[%s2082_s0 + $0x48] sm:$0xff]   ;;  %v1583_v8 = vld [vmem:[%s2082_s0 + $0x50] sm:$0xff]  }
   0x2   :  { %v1576_v1 = vld [vmem:[%s2082_s0 + $0xc0] sm:$0xff]   ;;  %1401 = vmatprep.subr.bf16.mxu0 %v1575_v0  ;;  %v1580_v5 = vld [vmem:[%s2082_s0 + $0xc8] sm:$0xff]   ;;  %v1584_v9 = vld [vmem:[%s2082_s0 + $0xd0] sm:$0xff]  }
   0x3   :  { %v1577_v2 = vld [vmem:[%s2082_s0] sm:$0xff]   ;;  %1423 = vmatprep.subr.bf16.mxu1 %v1576_v1  ;;  %v1581_v6 = vld [vmem:[%s2082_s0 + $0x8] sm:$0xff]   ;;  %v1585_v10 = vld [vmem:[%s2082_s0 + $0x10] sm:$0xff]  }
   0x4   :  { %v1578_v3 = vld [vmem:[%s2082_s0 + $0x80] sm:$0xff]   ;;  %1402 = vmatpush3.bf16.msra.mxu0 %v1577_v2  ;;  %v1582_v7 = vld [vmem:[%s2082_s0 + $0x88] sm:$0xff]   ;;  %v1586_v11 = vld [vmem:[%s2082_s0 + $0x90] sm:$0xff]  }
   0x5   :  { %1424 = vmatpush3.bf16.msra.mxu1 %v1578_v3  ;;  %1403 = vmatprep.subr.bf16.mxu0 %v1579_v4  ;;  %v1587_v12 = vld [vmem:[%s2082_s0 + $0x58] sm:$0xff]   ;;  %v1591_v16 = vld [vmem:[%s2082_s0 + $0x60] sm:$0xff]   ;;  %v1595_v20 = vld [vmem:[%s2082_s0 + $0x68] sm:$0xff]  }
   0x6   :  { %1425 = vmatprep.subr.bf16.mxu1 %v1580_v5  ;;  %v1588_v13 = vld [vmem:[%s2082_s0 + $0xd8] sm:$0xff]   ;;  %v1592_v17 = vld [vmem:[%s2082_s0 + $0xe0] sm:$0xff]   ;;  %v1596_v21 = vld [vmem:[%s2082_s0 + $0xe8] sm:$0xff]  }
   0x7   :  { %v1589_v14 = vld [vmem:[%s2082_s0 + $0x18] sm:$0xff]   ;;  %v1593_v18 = vld [vmem:[%s2082_s0 + $0x20] sm:$0xff]   ;;  %v1597_v22 = vld [vmem:[%s2082_s0 + $0x28] sm:$0xff]  }
   0x8   :  { %1404 = vmatpush3.bf16.msra.mxu0 %v1581_v6  ;;  %v1590_v15 = vld [vmem:[%s2082_s0 + $0x98] sm:$0xff]   ;;  %v1594_v19 = vld [vmem:[%s2082_s0 + $0xa0] sm:$0xff]   ;;  %v1598_v23 = vld [vmem:[%s2082_s0 + $0xa8] sm:$0xff]  }
   0x9   :  { %1426 = vmatpush3.bf16.msra.mxu1 %v1582_v7  ;;  %1405 = vmatprep.subr.bf16.mxu0 %v1583_v8  ;;  %v1599_v24 = vld [vmem:[%s2082_s0 + $0x70] sm:$0xff]   ;;  %v1603_v28 = vld [vmem:[%s2082_s0 + $0x78] sm:$0xff]   ;;  %v24_v32 = vld [vmem:[%s2083_s5] sm:$0xff] }
   0xa   :  { %1427 = vmatprep.subr.bf16.mxu1 %v1584_v9  ;;  %v1600_v25 = vld [vmem:[%s2082_s0 + $0xf0] sm:$0xff]   ;;  %v1604_v29 = vld [vmem:[%s2082_s0 + $0xf8] sm:$0xff]   ;;  %v25_v33 = vld [vmem:[%s2083_s5 + $0x8] sm:$0xff]  ;;  %v1278_v34 = vcombine.low %v24_v32, %v24_v32  ;;  %v1279_v35 = vcombine.high %v24_v32, %v24_v32 }
   0xb   :  { %v1601_v26 = vld [vmem:[%s2082_s0 + $0x30] sm:$0xff]   ;;  %v1605_v30 = vld [vmem:[%s2082_s0 + $0x38] sm:$0xff]   ;;  %v1280_v36 = vcombine.low %v25_v33, %v25_v33  ;;  %v1281_v37 = vcombine.high %v25_v33, %v25_v33  ;;  %v1611_v38 = vld [vmem:[%s2082_s0 + $0x140] sm:$0xff]  }
   0xc   :  { %1406 = vmatpush3.bf16.msra.mxu0 %v1585_v10  ;;  %v1602_v27 = vld [vmem:[%s2082_s0 + $0xb0] sm:$0xff]   ;;  %v1606_v31 = vld [vmem:[%s2082_s0 + $0xb8] sm:$0xff]   ;;  %v1612_v39 = vld [vmem:[%s2082_s0 + $0x100] sm:$0xff]   ;;  %896 = vmatprep.mubr.bf16.mxu0 %v1279_v35 }
   0xd   :  { %1428 = vmatpush3.bf16.msra.mxu1 %v1586_v11  ;;  %1407 = vmatprep.subr.bf16.mxu0 %v1587_v12  ;;  %v1613_v40 = vld [vmem:[%s2082_s0 + $0x1c0] sm:$0xff]   ;;  %v1615_v42 = vld [vmem:[%s2082_s0 + $0x148] sm:$0xff]   ;;  %v1619_v46 = vld [vmem:[%s2082_s0 + $0x150] sm:$0xff]  }
   0xe   :  { %1429 = vmatprep.subr.bf16.mxu1 %v1588_v13  ;;  %936 = vmatprep.mubr.bf16.mxu1 %v1281_v37  ;;  %v1614_v41 = vld [vmem:[%s2082_s0 + $0x180] sm:$0xff]   ;;  %v1616_v43 = vld [vmem:[%s2082_s0 + $0x108] sm:$0xff]   ;;  %v1620_v47 = vld [vmem:[%s2082_s0 + $0x110] sm:$0xff]  }
   0xf   :  { %v1617_v44 = vld [vmem:[%s2082_s0 + $0x1c8] sm:$0xff]   ;;  %v1621_v48 = vld [vmem:[%s2082_s0 + $0x1d0] sm:$0xff]   ;;  %v1623_v50 = vld [vmem:[%s2082_s0 + $0x158] sm:$0xff]  }
  0x10   :  { %1408 = vmatpush3.bf16.msra.mxu0 %v1589_v14  ;;  %v1618_v45 = vld [vmem:[%s2082_s0 + $0x188] sm:$0xff]   ;;  %v1622_v49 = vld [vmem:[%s2082_s0 + $0x190] sm:$0xff]   ;;  %v1624_v51 = vld [vmem:[%s2082_s0 + $0x118] sm:$0xff]  }
  0x11   :  { %1430 = vmatpush3.bf16.msra.mxu1 %v1590_v15  ;;  %1409 = vmatprep.subr.bf16.mxu0 %v1591_v16  ;;  %v1625_v52 = vld [vmem:[%s2082_s0 + $0x1d8] sm:$0xff]   ;;  %v1627_v54 = vld [vmem:[%s2082_s0 + $0x160] sm:$0xff]   ;;  %v1631_v58 = vld [vmem:[%s2082_s0 + $0x168] sm:$0xff]  }
  0x12   :  { %1431 = vmatprep.subr.bf16.mxu1 %v1592_v17  ;;  %v1626_v53 = vld [vmem:[%s2082_s0 + $0x198] sm:$0xff]   ;;  %v1628_v55 = vld [vmem:[%s2082_s0 + $0x120] sm:$0xff]   ;;  %v1632_v59 = vld [vmem:[%s2082_s0 + $0x128] sm:$0xff]  }
  0x13   :  { %v1629_v56 = vld [vmem:[%s2082_s0 + $0x1e0] sm:$0xff]   ;;  %v1633_v60 = vld [vmem:[%s2082_s0 + $0x1e8] sm:$0xff]   ;;  %v1635_v62 = vld [vmem:[%s2082_s0 + $0x170] sm:$0xff]  }
  0x14   :  { %1410 = vmatpush3.bf16.msra.mxu0 %v1593_v18  ;;  %v1630_v57 = vld [vmem:[%s2082_s0 + $0x1a0] sm:$0xff]   ;;  %v1634_v61 = vld [vmem:[%s2082_s0 + $0x1a8] sm:$0xff]   ;;  %v1636_v63 = vld [vmem:[%s2082_s0 + $0x130] sm:$0xff]  }
  0x15   :  { %1432 = vmatpush3.bf16.msra.mxu1 %v1594_v19  ;;  %1411 = vmatprep.subr.bf16.mxu0 %v1595_v20  ;;  %v1637_v0 = vld [vmem:[%s2082_s0 + $0x1f0] sm:$0xff]   ;;  %v1639_v2 = vld [vmem:[%s2082_s0 + $0x178] sm:$0xff]   ;;  %v1645_v9 = vld [vmem:[%s2082_s0 + $0x240] sm:$0xff]  }
  0x16   :  { %1433 = vmatprep.subr.bf16.mxu1 %v1596_v21  ;;  %v1638_v1 = vld [vmem:[%s2082_s0 + $0x1b0] sm:$0xff]   ;;  %v1640_v3 = vld [vmem:[%s2082_s0 + $0x138] sm:$0xff]   ;;  %v1648_v13 = vld [vmem:[%s2082_s0 + $0x200] sm:$0xff]  }
  0x17   :  { %v1641_v4 = vld [vmem:[%s2082_s0 + $0x1f8] sm:$0xff]   ;;  %v26_v6 = vld [vmem:[%s2083_s5 + $0x10] sm:$0xff]  ;;  %v1649_v14 = vld [vmem:[%s2082_s0 + $0x2c0] sm:$0xff]  }
  0x18   :  { %1412 = vmatpush3.bf16.msra.mxu0 %v1597_v22  ;;  %v1642_v5 = vld [vmem:[%s2082_s0 + $0x1b8] sm:$0xff]   ;;  %v1282_v7 = vcombine.low %v26_v6, %v26_v6  ;;  %v1283_v8 = vcombine.high %v26_v6, %v26_v6  ;;  %v1650_v15 = vld [vmem:[%s2082_s0 + $0x280] sm:$0xff]   ;;  %v1651_v16 = vld [vmem:[%s2082_s0 + $0x248] sm:$0xff]  }
  0x19   :  { %1434 = vmatpush3.bf16.msra.mxu1 %v1598_v23  ;;  %1413 = vmatprep.subr.bf16.mxu0 %v1599_v24  ;;  %v27_v10 = vld [vmem:[%s2083_s5 + $0x18] sm:$0xff]  ;;  %v1652_v17 = vld [vmem:[%s2082_s0 + $0x208] sm:$0xff]   ;;  %v1655_v20 = vld [vmem:[%s2082_s0 + $0x250] sm:$0xff]  }
  0x1a   :  { %1435 = vmatprep.subr.bf16.mxu1 %v1600_v25  ;;  %v1284_v11 = vcombine.low %v27_v10, %v27_v10  ;;  %v1285_v12 = vcombine.high %v27_v10, %v27_v10  ;;  %v1653_v18 = vld [vmem:[%s2082_s0 + $0x2c8] sm:$0xff]   ;;  %v1656_v21 = vld [vmem:[%s2082_s0 + $0x210] sm:$0xff]   ;;  %v1659_v24 = vld [vmem:[%s2082_s0 + $0x258] sm:$0xff]  }
  0x1b   :  { %v1654_v19 = vld [vmem:[%s2082_s0 + $0x288] sm:$0xff]   ;;  %v1657_v22 = vld [vmem:[%s2082_s0 + $0x2d0] sm:$0xff]   ;;  %v1660_v25 = vld [vmem:[%s2082_s0 + $0x218] sm:$0xff]  }
  0x1c   :  { %1414 = vmatpush3.bf16.msra.mxu0 %v1601_v26  ;;  %v1658_v23 = vld [vmem:[%s2082_s0 + $0x290] sm:$0xff]   ;;  %v1661_v26 = vld [vmem:[%s2082_s0 + $0x2d8] sm:$0xff]   ;;  %v1667_v32 = vld [vmem:[%s2082_s0 + $0x268] sm:$0xff]  }
  0x1d   :  { %1436 = vmatpush3.bf16.msra.mxu1 %v1602_v27  ;;  %1415 = vmatprep.subr.bf16.mxu0 %v1603_v28  ;;  %v1662_v27 = vld [vmem:[%s2082_s0 + $0x298] sm:$0xff]   ;;  %v1663_v28 = vld [vmem:[%s2082_s0 + $0x260] sm:$0xff]   ;;  %v1668_v33 = vld [vmem:[%s2082_s0 + $0x228] sm:$0xff]  }
  0x1e   :  { %1437 = vmatprep.subr.bf16.mxu1 %v1604_v29  ;;  %v1664_v29 = vld [vmem:[%s2082_s0 + $0x220] sm:$0xff]   ;;  %v1670_v35 = vld [vmem:[%s2082_s0 + $0x2a8] sm:$0xff]   ;;  %v1672_v37 = vld [vmem:[%s2082_s0 + $0x230] sm:$0xff]  }
  0x20   :  { %1416 = vmatpush3.bf16.msra.mxu0 %v1605_v30  ;;  %v1665_v30 = vld [vmem:[%s2082_s0 + $0x2e0] sm:$0xff]  }
  0x21   :  { %1438 = vmatpush3.bf16.msra.mxu1 %v1606_v31  ;;  %1445 = vmatprep.subr.bf16.mxu0 %v1611_v38  ;;  %v1666_v31 = vld [vmem:[%s2082_s0 + $0x2a0] sm:$0xff]   ;;  %v1673_v38 = vld [vmem:[%s2082_s0 + $0x2f0] sm:$0xff]  }
  0x22   :  { %1467 = vmatprep.subr.bf16.mxu1 %v1613_v40  ;;  %v1675_v40 = vld [vmem:[%s2082_s0 + $0x278] sm:$0xff]  }
  0x23   :  { %897 = vmatmul.mubr.bf16.vlgmr.msra.gmra.mrb[0].mxu0 %v1278_v34  ;;  %v1669_v34 = vld [vmem:[%s2082_s0 + $0x2e8] sm:$0xff]  }
  0x24   :  { %937 = vmatmul.mubr.bf16.vlgmr.msra.gmra.mrb[0].mxu1 %v1280_v36  ;;  %1446 = vmatpush3.bf16.msra.mxu0 %v1612_v39  ;;  %v1671_v36 = vld [vmem:[%s2082_s0 + $0x270] sm:$0xff]  }
  0x25   :  { %1468 = vmatpush3.bf16.msra.mxu1 %v1614_v41  ;;  %1447 = vmatprep.subr.bf16.mxu0 %v1615_v42  ;;  %v1674_v39 = vld [vmem:[%s2082_s0 + $0x2b0] sm:$0xff]   ;;  %v1676_v41 = vld [vmem:[%s2082_s0 + $0x238] sm:$0xff]  }
  0x26   :  { %1469 = vmatprep.subr.bf16.mxu1 %v1617_v44  ;;  %976 = vmatprep.mubr.bf16.mxu0 %v1283_v8  ;;  %v1677_v42 = vld [vmem:[%s2082_s0 + $0x2f8] sm:$0xff]   ;;  %v28_v44 = vld [vmem:[%s2083_s5 + $0x20] sm:$0xff] }
  0x27   :  { %1016 = vmatprep.mubr.bf16.mxu1 %v1285_v12 }
  0x28   :  { %1448 = vmatpush3.bf16.msra.mxu0 %v1616_v43  ;;  %v1678_v43 = vld [vmem:[%s2082_s0 + $0x2b8] sm:$0xff]  }
  0x29   :  { %1470 = vmatpush3.bf16.msra.mxu1 %v1618_v45  ;;  %1449 = vmatprep.subr.bf16.mxu0 %v1619_v46  ;;  %v29_v45 = vld [vmem:[%s2083_s5 + $0x28] sm:$0xff]  ;;  %v1286_v46 = vcombine.low %v28_v44, %v28_v44 }
  0x2a   :  { %1471 = vmatprep.subr.bf16.mxu1 %v1621_v48  ;;  %v1683_v48 = vld [vmem:[%s2082_s0 + $0x300] sm:$0xff]  }
  0x2c   :  { %1450 = vmatpush3.bf16.msra.mxu0 %v1620_v47  ;;  %v1287_v47 = vcombine.high %v28_v44, %v28_v44  ;;  %v1392_v44 = vld [vmem:[%s2087_s4] ss:$0 sm:$0xff] }
  0x2d   :  { %1472 = vmatpush3.bf16.msra.mxu1 %v1622_v49  ;;  %1451 = vmatprep.subr.bf16.mxu0 %v1623_v50  ;;  %v1288_v49 = vcombine.low %v29_v45, %v29_v45  ;;  %v1289_v50 = vcombine.high %v29_v45, %v29_v45 }
  0x2e   :  { %1473 = vmatprep.subr.bf16.mxu1 %v1625_v52  ;;  %v1684_v52 = vld [vmem:[%s2082_s0 + $0x308] sm:$0xff]  }
  0x30   :  { %1452 = vmatpush3.bf16.msra.mxu0 %v1624_v51  ;;  %v1694_v51 = vmov 0.0  }
  0x31   :  { %1474 = vmatpush3.bf16.msra.mxu1 %v1626_v53  ;;  %1453 = vmatprep.subr.bf16.mxu0 %v1627_v54  ;;  %v1685_v53 = vld [vmem:[%s2083_s5 + $0x30] ss:$0 sps:$4 sm:$0xff]   ;;  %v1686_v54 = vld [vmem:[%s2084_s3] sm:$0xff]  }
  0x32   :  { %1475 = vmatprep.subr.bf16.mxu1 %v1629_v56  ;;  %v1688_v56 = vld [vmem:[%s2084_s3 + $0x10] sm:$0xff]  }
  0x34   :  { %1454 = vmatpush3.bf16.msra.mxu0 %v1628_v55  ;;  %v1687_v55 = vld [vmem:[%s2084_s3 + $0x8] sm:$0xff]  }
  0x35   :  { %1476 = vmatpush3.bf16.msra.mxu1 %v1630_v57  ;;  %1455 = vmatprep.subr.bf16.mxu0 %v1631_v58  ;;  %v1689_v57 = vld [vmem:[%s2084_s3 + $0x18] sm:$0xff]   ;;  %v1690_v58 = vld [vmem:[%s2084_s3 + $0x20] sm:$0xff]  }
  0x36   :  { %1477 = vmatprep.subr.bf16.mxu1 %v1633_v60  ;;  %v1692_v60 = vld [vmem:[%s2084_s3 + $0x30] sm:$0xff]  }
  0x38   :  { %1456 = vmatpush3.bf16.msra.mxu0 %v1632_v59  ;;  %v1691_v59 = vld [vmem:[%s2084_s3 + $0x28] sm:$0xff]  }
  0x39   :  { %1478 = vmatpush3.bf16.msra.mxu1 %v1634_v61  ;;  %1457 = vmatprep.subr.bf16.mxu0 %v1635_v62  ;;  %v1693_v61 = vld [vmem:[%s2084_s3 + $0x38] sm:$0xff]  }
  0x3a   :  { %1479 = vmatprep.subr.bf16.mxu1 %v1637_v0 }
  0x3c   :  { %1458 = vmatpush3.bf16.msra.mxu0 %v1636_v63 }
  0x3d   :  { %1480 = vmatpush3.bf16.msra.mxu1 %v1638_v1  ;;  %1459 = vmatprep.subr.bf16.mxu0 %v1639_v2 }
  0x3e   :  { %1481 = vmatprep.subr.bf16.mxu1 %v1641_v4 }
  0x40   :  { %1460 = vmatpush3.bf16.msra.mxu0 %v1640_v3 }
  0x41   :  { %1482 = vmatpush3.bf16.msra.mxu1 %v1642_v5  ;;  %1489 = vmatprep.subr.bf16.mxu0 %v1645_v9 }
  0x42   :  { %1511 = vmatprep.subr.bf16.mxu1 %v1649_v14 }
  0x43   :  { %977 = vmatmul.mubr.bf16.vlgmr.msra.gmra.mrb[4].mxu0 %v1282_v7 }
  0x44   :  { %1490 = vmatpush3.bf16.msra.mxu0 %v1648_v13  ;;  %1017 = vmatmul.mubr.bf16.vlgmr.msra.gmra.mrb[4].mxu1 %v1284_v11 }
  0x45   :  { %1512 = vmatpush3.bf16.msra.mxu1 %v1650_v15  ;;  %1491 = vmatprep.subr.bf16.mxu0 %v1651_v16 }
  0x46   :  { %1513 = vmatprep.subr.bf16.mxu1 %v1653_v18  ;;  %1056 = vmatprep.mubr.bf16.mxu0 %v1287_v47 }
  0x47   :  { %1096 = vmatprep.mubr.bf16.mxu1 %v1289_v50 }
  0x48   :  { %1492 = vmatpush3.bf16.msra.mxu0 %v1652_v17 }
  0x49   :  { %1514 = vmatpush3.bf16.msra.mxu1 %v1654_v19  ;;  %1493 = vmatprep.subr.bf16.mxu0 %v1655_v20 }
  0x4a   :  { %1515 = vmatprep.subr.bf16.mxu1 %v1657_v22 }
  0x4c   :  { %1494 = vmatpush3.bf16.msra.mxu0 %v1656_v21 }
  0x4d   :  { %1516 = vmatpush3.bf16.msra.mxu1 %v1658_v23  ;;  %1495 = vmatprep.subr.bf16.mxu0 %v1659_v24 }
  0x4e   :  { %1517 = vmatprep.subr.bf16.mxu1 %v1661_v26 }
  0x50   :  { %1496 = vmatpush3.bf16.msra.mxu0 %v1660_v25 }
  0x51   :  { %1518 = vmatpush3.bf16.msra.mxu1 %v1662_v27  ;;  %1497 = vmatprep.subr.bf16.mxu0 %v1663_v28 }
  0x52   :  { %1519 = vmatprep.subr.bf16.mxu1 %v1665_v30 }
  0x54   :  { %1498 = vmatpush3.bf16.msra.mxu0 %v1664_v29 }
  0x55   :  { %1520 = vmatpush3.bf16.msra.mxu1 %v1666_v31  ;;  %1499 = vmatprep.subr.bf16.mxu0 %v1667_v32 }
  0x56   :  { %1521 = vmatprep.subr.bf16.mxu1 %v1669_v34  ;;  %v1390_v34 = vld [vmem:[%s2085_s1] ss:$0 sm:$0xff] }
  0x58   :  { %1500 = vmatpush3.bf16.msra.mxu0 %v1668_v33 }
  0x59   :  { %1522 = vmatpush3.bf16.msra.mxu1 %v1670_v35  ;;  %1501 = vmatprep.subr.bf16.mxu0 %v1671_v36 }
  0x5a   :  { %1523 = vmatprep.subr.bf16.mxu1 %v1673_v38 }
  0x5c   :  { %1502 = vmatpush3.bf16.msra.mxu0 %v1672_v37  ;;  %v1391_v37 = vld [vmem:[%s2086_s2] ss:$0 sm:$0xff] }
  0x5d   :  { %1524 = vmatpush3.bf16.msra.mxu1 %v1674_v39  ;;  %1503 = vmatprep.subr.bf16.mxu0 %v1675_v40 }
  0x5e   :  { %1525 = vmatprep.subr.bf16.mxu1 %v1677_v42 }
  0x60   :  { %1504 = vmatpush3.bf16.msra.mxu0 %v1676_v41 }
  0x61   :  { %1545 = vmatprep.subr.bf16.mxu0 %v1694_v51  ;;  %1526 = vmatpush3.bf16.msra.mxu1 %v1678_v43 }
  0x62   :  { %1553 = vmatprep.subr.bf16.mxu1 %v1694_v51 }
  0x63   :  { %1057 = vmatmul.mubr.bf16.vlgmr.msra.gmra.mrb[8].mxu0 %v1286_v46 }
  0x64   :  { %1546 = vmatpush3.bf16.msra.mxu0 %v1683_v48  ;;  %1549 = vmatprep.mubr.msk.bf16.mxu0 %vm1695_vm0, %v1694_v51 }
  0x65   :  { %1097 = vmatmul.mubr.bf16.vlgmr.msra.gmra.mrb[8].mxu1 %v1288_v49  ;;  %1547 = vmatprep.subr.bf16.mxu0 %v1694_v51 }
  0x66   :  { %1569 = vmatprep.mubr.msk.bf16.mxu1 %vm1695_vm0, %v1694_v51  ;;  %1554 = vmatpush3.bf16.msra.mxu1 %v1686_v54 }
  0x67   :  { %1555 = vmatprep.subr.bf16.mxu1 %v1694_v51 }
  0x68   :  { %1548 = vmatpush3.bf16.msra.mxu0 %v1684_v52 }
  0x6a   :  { %1556 = vmatpush3.bf16.msra.mxu1 %v1687_v55 }
  0x6b   :  { %1550 = vmatmul.mubr.msk.bf16.vlgmr.msra.gmra.mrb[12].mxu0 %vm860_vm1, %v1685_v53  ;;  %1557 = vmatprep.subr.bf16.mxu1 %v1694_v51 }
  0x6e   :  { %1558 = vmatpush3.bf16.msra.mxu1 %v1688_v56 }
  0x6f   :  { %1559 = vmatprep.subr.bf16.mxu1 %v1694_v51 }
  0x72   :  { %1560 = vmatpush3.bf16.msra.mxu1 %v1689_v57 }
  0x73   :  { %1561 = vmatprep.subr.bf16.mxu1 %v1694_v51 }
  0x76   :  { %1562 = vmatpush3.bf16.msra.mxu1 %v1690_v58 }
  0x77   :  { %1563 = vmatprep.subr.bf16.mxu1 %v1694_v51 }
  0x7a   :  { %1564 = vmatpush3.bf16.msra.mxu1 %v1691_v59 }
  0x7b   :  { %1565 = vmatprep.subr.bf16.mxu1 %v1694_v51 }
  0x7e   :  { %1566 = vmatpush3.bf16.msra.mxu1 %v1692_v60 }
  0x7f   :  { %1567 = vmatprep.subr.bf16.mxu1 %v1694_v51 }
  0x82   :  { %1568 = vmatpush3.bf16.msra.mxu1 %v1693_v61 }
  0xf6   :  { %v1417_v62 = vpop.f32.mrb[0].mxu0 }
  0xf7   :  { %v1439_v63 = vpop.f32.mrb[0].mxu1  ;;  %v1418_v0 = vpop.f32.mrb[1].mxu0 }
  0xf8   :  { %v1440_v1 = vpop.f32.mrb[1].mxu1  ;;  %v1419_v2 = vadd.f32 %v1418_v0, %v1417_v62  ;;  %v1420_v4 = vpop.f32.mrb[2].mxu0 }
  0xf9   :  { %v1441_v3 = vadd.f32 %v1440_v1, %v1439_v63  ;;  %v1442_v5 = vpop.f32.mrb[2].mxu1  ;;  %v1421_v6 = vpop.f32.mrb[3].mxu0 }
  0xfa   :  { %v1443_v7 = vpop.f32.mrb[3].mxu1 }
  0xfb   :  { %v939_v8 = vadd.f32 %v1441_v3, %v1419_v2 }
 0x116   :  { %v1461_v9 = vpop.f32.mrb[4].mxu0 }
 0x117   :  { %v1462_v10 = vpop.f32.mrb[5].mxu0  ;;  %v1483_v13 = vpop.f32.mrb[4].mxu1 }
 0x118   :  { %v1463_v11 = vadd.f32 %v1462_v10, %v1461_v9  ;;  %v1464_v12 = vpop.f32.mrb[6].mxu0  ;;  %v1484_v15 = vpop.f32.mrb[5].mxu1 }
 0x119   :  { %v1465_v14 = vpop.f32.mrb[7].mxu0  ;;  %v1485_v17 = vadd.f32 %v1484_v15, %v1483_v13  ;;  %v1486_v18 = vpop.f32.mrb[6].mxu1 }
 0x11a   :  { %v979_v16 = vadd.f32 %v1463_v11, %v939_v8  ;;  %v1487_v19 = vpop.f32.mrb[7].mxu1 }
 0x11c   :  { %v1019_v20 = vadd.f32 %v1485_v17, %v979_v16 }
 0x136   :  { %v1505_v21 = vpop.f32.mrb[8].mxu0 }
 0x137   :  { %v1506_v22 = vpop.f32.mrb[9].mxu0 }
 0x138   :  { %v1507_v23 = vadd.f32 %v1506_v22, %v1505_v21  ;;  %v1527_v24 = vpop.f32.mrb[8].mxu1  ;;  %v1508_v25 = vpop.f32.mrb[10].mxu0 }
 0x139   :  { %v1528_v26 = vpop.f32.mrb[9].mxu1  ;;  %v1509_v27 = vpop.f32.mrb[11].mxu0 }
 0x13a   :  { %v1059_v28 = vadd.f32 %v1507_v23, %v1019_v20  ;;  %v1529_v29 = vadd.f32 %v1528_v26, %v1527_v24  ;;  %v1530_v30 = vpop.f32.mrb[10].mxu1 }
 0x13b   :  { %v1531_v31 = vpop.f32.mrb[11].mxu1 }
 0x13c   :  { %v1099_v32 = vadd.f32 %v1529_v29, %v1059_v28 }
 0x13e   :  { %v1138_v33 = vpop.f32.mrb[12].mxu0 }
 0x13f   :  { %v1139_v35 = vadd.f32 %v1138_v33, %v1099_v32  ;;  %v1551_v36 = vpop.f32.mrb[13].mxu0 }
 0x140   :  { %v1141_v38 = vpop.f32.mrb[14].mxu0 }
 0x141   :  { %v1151_v39 = vmul.f32 %v1390_v34, %v1139_v35  ;;  %v1552_v40 = vpop.f32.mrb[15].mxu0 }
 0x143   :  { %v1159_v41 = vadd.f32 %v1391_v37, %v1151_v39 }
 0x145   :  { %v1160_v42 = vmax.f32 %v1159_v41, 0.0 }
 0x147   :  { %v1161_v43 = vpack.c.bf16 %v1160_v42, %v1160_v42 }
 0x149   :  { %1570 = vmatmul.mubr.bf16.vlgmr.msra.gmra.mrb[12].mxu1 %v1161_v43 }
 0x21c   :  { %v1267_v45 = vpop.f32.mrb[12].mxu1 }
 0x21d   :  { %v1268_v46 = vadd.f32 %v1392_v44, %v1267_v45  ;;  %v1571_v47 = vpop.f32.mrb[13].mxu1 }
 0x21e   :  { %v1270_v48 = vpop.f32.mrb[14].mxu1 }
 0x21f   :  { %1273 = vst [vmem:[%s2088_s6] sm:$0xff] %v1268_v46  ;;  %v1572_v49 = vpop.f32.mrb[15].mxu1 }

</bundles_post_ra>
